<compile_context>
chip_gen: v6e
topology: v6e:2x2x1
jax: 0.10.0
libtpu: 0.0.40
codegen_flags: <defaults>
</compile_context>

<pallas_src>
import functools
import math

import jax
import jax.numpy as jnp
from jax.experimental import pallas as pl
from jax.experimental.pallas import tpu as pltpu


def _win(start, size, step):
    """Static spatial window for ref slicing (strided only when step > 1)."""
    if step == 1:
        return pl.ds(start, size)
    return pl.ds(start, size, stride=step)


def _sepconv2d_kernel(x_ref, wdw_ref, bdw_ref, wpw_ref, bpw_ref, o_ref, *scratch,
                      c_in, c_out, k_h, k_w, stride, dilation, padding,
                      h_in, w_in, h_out, w_out):
    """Fused depthwise-conv -> ReLU -> pointwise-1x1 for one batch element.

    x_ref:   (1, c_in, H, W)          VMEM  (unpadded input image)
    wdw_ref: (c_in * k_h * k_w,)      SMEM  depthwise weights (flat)
    bdw_ref: (c_in,)                  SMEM  depthwise bias
    wpw_ref: (c_out * c_in,)          SMEM  pointwise weights (flat)
    bpw_ref: (c_out,)                 SMEM  pointwise bias
    o_ref:   (1, c_out, h_out, w_out) VMEM
    scratch: optional (c_in, Hp, Wp)  VMEM  zero-padded image (only if padding>0)
    """
    if padding > 0:
        pad_ref = scratch[0]
        # Zero the whole padded buffer (cheap: a handful of vregs), then copy
        # the image into the interior.  This replaces the host-side jnp.pad.
        pad_ref[...] = jnp.zeros_like(pad_ref)
        pad_ref[:, pl.ds(padding, h_in), pl.ds(padding, w_in)] = x_ref[0]

        def tap(ci, kh, kw):
            return pad_ref[ci,
                           _win(kh * dilation, h_out, stride),
                           _win(kw * dilation, w_out, stride)]
    else:
        def tap(ci, kh, kw):
            return x_ref[0, ci,
                         _win(kh * dilation, h_out, stride),
                         _win(kw * dilation, w_out, stride)]

    # ---- Depthwise conv + bias + ReLU (per-channel, VPU scalar-broadcast FMAs).
    dw_act = []
    for ci in range(c_in):
        acc = jnp.full((h_out, w_out), bdw_ref[ci], dtype=jnp.float32)
        for kh in range(k_h):
            for kw in range(k_w):
                w = wdw_ref[ci * (k_h * k_w) + kh * k_w + kw]
                acc = acc + tap(ci, kh, kw).astype(jnp.float32) * w
        dw_act.append(jnp.maximum(acc, 0.0))   # act_layer = nn.ReLU (default)

    # ---- Pointwise 1x1 conv (channel mix) + bias, still unrolled VPU FMAs.
    for co in range(c_out):
        y = jnp.full((h_out, w_out), bpw_ref[co], dtype=jnp.float32)
        for ci in range(c_in):
            y = y + dw_act[ci] * wpw_ref[co * c_in + ci]
        o_ref[0, co, :, :] = y.astype(o_ref.dtype)


def sep_conv2d_forward(x, params, *, stride=1, padding=0, dilation=1):
    """Replicates SepConv2d(in_ch, out_ch, k, stride, padding, dilation).forward
    on an NCHW input x. Returns NCHW output (B, c_out, Ho, Wo)."""
    B, c_in, H, W = x.shape
    w_dw = params["w_dw"]                      # (c_in, kH, kW)
    b_dw = params["b_dw"]                      # (c_in,)
    w_pw = params["w_pw"]                      # (c_out, c_in)
    b_pw = params["b_pw"]                      # (c_out,)
    c_out = int(w_pw.shape[0])
    k_h, k_w = int(w_dw.shape[1]), int(w_dw.shape[2])

    h_out = (H + 2 * padding - dilation * (k_h - 1) - 1) // stride + 1
    w_out = (W + 2 * padding - dilation * (k_w - 1) - 1) // stride + 1
    Hp, Wp = H + 2 * padding, W + 2 * padding

    # Flatten tiny weights to 1-D for SMEM friendliness (free-ish reshapes).
    w_dw_flat = w_dw.reshape(c_in * k_h * k_w)
    w_pw_flat = w_pw.reshape(c_out * c_in)

    kernel = functools.partial(
        _sepconv2d_kernel,
        c_in=c_in, c_out=c_out, k_h=k_h, k_w=k_w,
        stride=stride, dilation=dilation, padding=padding,
        h_in=H, w_in=W, h_out=h_out, w_out=w_out)

    scratch_shapes = []
    if padding > 0:
        scratch_shapes.append(pltpu.VMEM((c_in, Hp, Wp), x.dtype))

    flops = 2 * B * h_out * w_out * (c_in * k_h * k_w + c_in * c_out)
    itemsize = jnp.dtype(x.dtype).itemsize
    bytes_accessed = itemsize * (x.size + w_dw.size + b_dw.size + w_pw.size
                                 + b_pw.size + B * c_out * h_out * w_out)

    out = pl.pallas_call(
        kernel,
        out_shape=jax.ShapeDtypeStruct((B, c_out, h_out, w_out), x.dtype),
        grid_spec=pltpu.PrefetchScalarGridSpec(
            num_scalar_prefetch=0,
            grid=(B,),
            in_specs=[
                # Whole image for one batch element per grid step.
                pl.BlockSpec((1, c_in, H, W), lambda b: (b, 0, 0, 0)),
                # Tiny weights / biases live in SMEM -> scalar-broadcast FMAs.
                pl.BlockSpec(memory_space=pltpu.MemorySpace.SMEM),
                pl.BlockSpec(memory_space=pltpu.MemorySpace.SMEM),
                pl.BlockSpec(memory_space=pltpu.MemorySpace.SMEM),
                pl.BlockSpec(memory_space=pltpu.MemorySpace.SMEM),
            ],
            out_specs=pl.BlockSpec((1, c_out, h_out, w_out),
                                   lambda b: (b, 0, 0, 0)),
            scratch_shapes=scratch_shapes,
        ),
        compiler_params=pltpu.CompilerParams(
            dimension_semantics=("parallel",)),
        cost_estimate=pl.CostEstimate(
            flops=flops, transcendentals=0, bytes_accessed=int(bytes_accessed)),
    )(x, w_dw_flat, b_dw, w_pw_flat, b_pw)
    return out


def init_sepconv2d_params(key, in_channels, out_channels, kernel_size):
    """Deterministic synthetic init mirroring PyTorch Conv2d default bounds."""
    k1, k2, k3, k4 = jax.random.split(key, 4)
    kH = kW = kernel_size
    bound_dw = 1.0 / math.sqrt(kH * kW)          # depthwise fan_in = 1*kH*kW
    bound_pw = 1.0 / math.sqrt(in_channels)      # pointwise fan_in = c_in*1*1
    return {
        "w_dw": jax.random.uniform(k1, (in_channels, kH, kW), jnp.float32,
                                   -bound_dw, bound_dw),
        "b_dw": jax.random.uniform(k2, (in_channels,), jnp.float32,
                                   -bound_dw, bound_dw),
        "w_pw": jax.random.uniform(k3, (out_channels, in_channels), jnp.float32,
                                   -bound_pw, bound_pw),
        "b_pw": jax.random.uniform(k4, (out_channels,), jnp.float32,
                                   -bound_pw, bound_pw),
    }


if __name__ == "__main__":
    key = jax.random.PRNGKey(0)
    kx, kp = jax.random.split(key)

    B, C_IN, H, W = 2, 4, 16, 16
    C_OUT, K, STRIDE, PAD, DIL = 8, 3, 1, 1, 1

    x = jax.random.normal(kx, (B, C_IN, H, W), jnp.float32)
    params = init_sepconv2d_params(kp, C_IN, C_OUT, K)

    fwd = jax.jit(functools.partial(sep_conv2d_forward,
                                    stride=STRIDE, padding=PAD, dilation=DIL))
    y = fwd(x, params)
    y = jax.block_until_ready(y)

    # Pure-JAX reference of SepConv2d.forward (depthwise -> ReLU -> pointwise).
    ref = jax.lax.conv_general_dilated(
        x, params["w_dw"].reshape(C_IN, 1, K, K),
        window_strides=(STRIDE, STRIDE),
        padding=[(PAD, PAD), (PAD, PAD)],
        rhs_dilation=(DIL, DIL),
        dimension_numbers=("NCHW", "OIHW", "NCHW"),
        feature_group_count=C_IN,
        precision=jax.lax.Precision.HIGHEST)
    ref = jnp.maximum(ref + params["b_dw"].reshape(1, C_IN, 1, 1), 0.0)
    ref = jax.lax.conv_general_dilated(
        ref, params["w_pw"].reshape(C_OUT, C_IN, 1, 1),
        window_strides=(1, 1), padding="VALID",
        dimension_numbers=("NCHW", "OIHW", "NCHW"),
        precision=jax.lax.Precision.HIGHEST)
    ref = ref + params["b_pw"].reshape(1, C_OUT, 1, 1)

    assert y.shape == (B, C_OUT, H, W), y.shape
    err = float(jnp.max(jnp.abs(y - ref)))
    assert jnp.allclose(y, ref, atol=1e-4, rtol=1e-4), err
    print("KERNEL_OK")
</pallas_src>

<mosaic_0001>
module attributes {stable_mosaic.version = 11 : i64} {
  func.func @_sepconv2d_kernel(%arg0: i32, %arg1: memref<1x4x16x16xf32, #tpu.memory_space<vmem>>, %arg2: memref<36xf32, #tpu.memory_space<smem>>, %arg3: memref<4xf32, #tpu.memory_space<smem>>, %arg4: memref<32xf32, #tpu.memory_space<smem>>, %arg5: memref<8xf32, #tpu.memory_space<smem>>, %arg6: memref<1x8x16x16xf32, #tpu.memory_space<vmem>>, %arg7: memref<4x18x18xf32, #tpu.memory_space<vmem>>) attributes {dimension_semantics = [#tpu.dimension_semantics<parallel>], iteration_bounds = array<i64: 2>, scalar_prefetch = 0 : i64, scratch_operands = 1 : i64, tpu.core_type = #tpu.core_type<tc>, window_params = [{transform_indices = @transform_0, window_bounds = array<i64: 1, 4, 16, 16>}, {transform_indices = @transform_1, window_bounds = array<i64: 36>}, {transform_indices = @transform_2, window_bounds = array<i64: 4>}, {transform_indices = @transform_3, window_bounds = array<i64: 32>}, {transform_indices = @transform_4, window_bounds = array<i64: 8>}, {transform_indices = @transform_5, window_bounds = array<i64: 1, 8, 16, 16>}]} {
    %cst = arith.constant 0.000000e+00 : f32
    %0 = vector.broadcast %cst : f32 to vector<4x18x18xf32>
    %c0 = arith.constant 0 : index
    %c0_0 = arith.constant 0 : index
    %c0_1 = arith.constant 0 : index
    %1 = vector.load %arg7[%c0, %c0_0, %c0_1] : memref<4x18x18xf32, #tpu.memory_space<vmem>>, vector<4x18x18xf32>
    tpu.vector_store %arg7[%c0, %c0_0, %c0_1], %0 {strides = array<i32>} : memref<4x18x18xf32, #tpu.memory_space<vmem>>, vector<4x18x18xf32>,
    %c0_2 = arith.constant 0 : index
    %c0_3 = arith.constant 0 : index
    %c0_4 = arith.constant 0 : index
    %c0_5 = arith.constant 0 : index
    %2 = vector.load %arg1[%c0_2, %c0_3, %c0_4, %c0_5] : memref<1x4x16x16xf32, #tpu.memory_space<vmem>>, vector<1x4x16x16xf32>
    %3 = vector.shape_cast %2 : vector<1x4x16x16xf32> to vector<4x16x16xf32>
    %c0_6 = arith.constant 0 : index
    %c1 = arith.constant 1 : index
    %c1_7 = arith.constant 1 : index
    %4 = vector.load %arg7[%c0_6, %c1, %c1_7] : memref<4x18x18xf32, #tpu.memory_space<vmem>>, vector<4x16x16xf32>
    tpu.vector_store %arg7[%c0_6, %c1, %c1_7], %3 {strides = array<i32>} : memref<4x18x18xf32, #tpu.memory_space<vmem>>, vector<4x16x16xf32>,
    %c0_8 = arith.constant 0 : index
    %5 = memref.load %arg3[%c0_8] : memref<4xf32, #tpu.memory_space<smem>>
    %6 = vector.broadcast %5 : f32 to vector<16x16xf32>
    %c0_9 = arith.constant 0 : index
    %7 = memref.load %arg2[%c0_9] : memref<36xf32, #tpu.memory_space<smem>>
    %c0_10 = arith.constant 0 : index
    %c0_11 = arith.constant 0 : index
    %c0_12 = arith.constant 0 : index
    %8 = vector.load %arg7[%c0_10, %c0_11, %c0_12] : memref<4x18x18xf32, #tpu.memory_space<vmem>>, vector<1x16x16xf32>
    %9 = vector.shape_cast %8 : vector<1x16x16xf32> to vector<16x16xf32>
    %10 = vector.broadcast %7 : f32 to vector<16x16xf32>
    %11 = arith.mulf %9, %10 : vector<16x16xf32>
    %12 = arith.addf %6, %11 : vector<16x16xf32>
    %c1_13 = arith.constant 1 : index
    %13 = memref.load %arg2[%c1_13] : memref<36xf32, #tpu.memory_space<smem>>
    %c0_14 = arith.constant 0 : index
    %c0_15 = arith.constant 0 : index
    %c1_16 = arith.constant 1 : index
    %14 = vector.load %arg7[%c0_14, %c0_15, %c1_16] : memref<4x18x18xf32, #tpu.memory_space<vmem>>, vector<1x16x16xf32>
    %15 = vector.shape_cast %14 : vector<1x16x16xf32> to vector<16x16xf32>
    %16 = vector.broadcast %13 : f32 to vector<16x16xf32>
    %17 = arith.mulf %15, %16 : vector<16x16xf32>
    %18 = arith.addf %12, %17 : vector<16x16xf32>
    %c2 = arith.constant 2 : index
    %19 = memref.load %arg2[%c2] : memref<36xf32, #tpu.memory_space<smem>>
    %c0_17 = arith.constant 0 : index
    %c0_18 = arith.constant 0 : index
    %c2_19 = arith.constant 2 : index
    %20 = vector.load %arg7[%c0_17, %c0_18, %c2_19] : memref<4x18x18xf32, #tpu.memory_space<vmem>>, vector<1x16x16xf32>
    %21 = vector.shape_cast %20 : vector<1x16x16xf32> to vector<16x16xf32>
    %22 = vector.broadcast %19 : f32 to vector<16x16xf32>
    %23 = arith.mulf %21, %22 : vector<16x16xf32>
    %24 = arith.addf %18, %23 : vector<16x16xf32>
    %c3 = arith.constant 3 : index
    %25 = memref.load %arg2[%c3] : memref<36xf32, #tpu.memory_space<smem>>
    %c0_20 = arith.constant 0 : index
    %c1_21 = arith.constant 1 : index
    %c0_22 = arith.constant 0 : index
    %26 = vector.load %arg7[%c0_20, %c1_21, %c0_22] : memref<4x18x18xf32, #tpu.memory_space<vmem>>, vector<1x16x16xf32>
    %27 = vector.shape_cast %26 : vector<1x16x16xf32> to vector<16x16xf32>
    %28 = vector.broadcast %25 : f32 to vector<16x16xf32>
    %29 = arith.mulf %27, %28 : vector<16x16xf32>
    %30 = arith.addf %24, %29 : vector<16x16xf32>
    %c4 = arith.constant 4 : index
    %31 = memref.load %arg2[%c4] : memref<36xf32, #tpu.memory_space<smem>>
    %c0_23 = arith.constant 0 : index
    %c1_24 = arith.constant 1 : index
    %c1_25 = arith.constant 1 : index
    %32 = vector.load %arg7[%c0_23, %c1_24, %c1_25] : memref<4x18x18xf32, #tpu.memory_space<vmem>>, vector<1x16x16xf32>
    %33 = vector.shape_cast %32 : vector<1x16x16xf32> to vector<16x16xf32>
    %34 = vector.broadcast %31 : f32 to vector<16x16xf32>
    %35 = arith.mulf %33, %34 : vector<16x16xf32>
    %36 = arith.addf %30, %35 : vector<16x16xf32>
    %c5 = arith.constant 5 : index
    %37 = memref.load %arg2[%c5] : memref<36xf32, #tpu.memory_space<smem>>
    %c0_26 = arith.constant 0 : index
    %c1_27 = arith.constant 1 : index
    %c2_28 = arith.constant 2 : index
    %38 = vector.load %arg7[%c0_26, %c1_27, %c2_28] : memref<4x18x18xf32, #tpu.memory_space<vmem>>, vector<1x16x16xf32>
    %39 = vector.shape_cast %38 : vector<1x16x16xf32> to vector<16x16xf32>
    %40 = vector.broadcast %37 : f32 to vector<16x16xf32>
    %41 = arith.mulf %39, %40 : vector<16x16xf32>
    %42 = arith.addf %36, %41 : vector<16x16xf32>
    %c6 = arith.constant 6 : index
    %43 = memref.load %arg2[%c6] : memref<36xf32, #tpu.memory_space<smem>>
    %c0_29 = arith.constant 0 : index
    %c2_30 = arith.constant 2 : index
    %c0_31 = arith.constant 0 : index
    %44 = vector.load %arg7[%c0_29, %c2_30, %c0_31] : memref<4x18x18xf32, #tpu.memory_space<vmem>>, vector<1x16x16xf32>
    %45 = vector.shape_cast %44 : vector<1x16x16xf32> to vector<16x16xf32>
    %46 = vector.broadcast %43 : f32 to vector<16x16xf32>
    %47 = arith.mulf %45, %46 : vector<16x16xf32>
    %48 = arith.addf %42, %47 : vector<16x16xf32>
    %c7 = arith.constant 7 : index
    %49 = memref.load %arg2[%c7] : memref<36xf32, #tpu.memory_space<smem>>
    %c0_32 = arith.constant 0 : index
    %c2_33 = arith.constant 2 : index
    %c1_34 = arith.constant 1 : index
    %50 = vector.load %arg7[%c0_32, %c2_33, %c1_34] : memref<4x18x18xf32, #tpu.memory_space<vmem>>, vector<1x16x16xf32>
    %51 = vector.shape_cast %50 : vector<1x16x16xf32> to vector<16x16xf32>
    %52 = vector.broadcast %49 : f32 to vector<16x16xf32>
    %53 = arith.mulf %51, %52 : vector<16x16xf32>
    %54 = arith.addf %48, %53 : vector<16x16xf32>
    %c8 = arith.constant 8 : index
    %55 = memref.load %arg2[%c8] : memref<36xf32, #tpu.memory_space<smem>>
    %c0_35 = arith.constant 0 : index
    %c2_36 = arith.constant 2 : index
    %c2_37 = arith.constant 2 : index
    %56 = vector.load %arg7[%c0_35, %c2_36, %c2_37] : memref<4x18x18xf32, #tpu.memory_space<vmem>>, vector<1x16x16xf32>
    %57 = vector.shape_cast %56 : vector<1x16x16xf32> to vector<16x16xf32>
    %58 = vector.broadcast %55 : f32 to vector<16x16xf32>
    %59 = arith.mulf %57, %58 : vector<16x16xf32>
    %60 = arith.addf %54, %59 : vector<16x16xf32>
    %cst_38 = arith.constant 0.000000e+00 : f32
    %61 = vector.broadcast %cst_38 : f32 to vector<16x16xf32>
    %62 = arith.maximumf %60, %61 : vector<16x16xf32>
    %c1_39 = arith.constant 1 : index
    %63 = memref.load %arg3[%c1_39] : memref<4xf32, #tpu.memory_space<smem>>
    %64 = vector.broadcast %63 : f32 to vector<16x16xf32>
    %c9 = arith.constant 9 : index
    %65 = memref.load %arg2[%c9] : memref<36xf32, #tpu.memory_space<smem>>
    %c1_40 = arith.constant 1 : index
    %c0_41 = arith.constant 0 : index
    %c0_42 = arith.constant 0 : index
    %66 = vector.load %arg7[%c1_40, %c0_41, %c0_42] : memref<4x18x18xf32, #tpu.memory_space<vmem>>, vector<1x16x16xf32>
    %67 = vector.shape_cast %66 : vector<1x16x16xf32> to vector<16x16xf32>
    %68 = vector.broadcast %65 : f32 to vector<16x16xf32>
    %69 = arith.mulf %67, %68 : vector<16x16xf32>
    %70 = arith.addf %64, %69 : vector<16x16xf32>
    %c10 = arith.constant 10 : index
    %71 = memref.load %arg2[%c10] : memref<36xf32, #tpu.memory_space<smem>>
    %c1_43 = arith.constant 1 : index
    %c0_44 = arith.constant 0 : index
    %c1_45 = arith.constant 1 : index
    %72 = vector.load %arg7[%c1_43, %c0_44, %c1_45] : memref<4x18x18xf32, #tpu.memory_space<vmem>>, vector<1x16x16xf32>
    %73 = vector.shape_cast %72 : vector<1x16x16xf32> to vector<16x16xf32>
    %74 = vector.broadcast %71 : f32 to vector<16x16xf32>
    %75 = arith.mulf %73, %74 : vector<16x16xf32>
    %76 = arith.addf %70, %75 : vector<16x16xf32>
    %c11 = arith.constant 11 : index
    %77 = memref.load %arg2[%c11] : memref<36xf32, #tpu.memory_space<smem>>
    %c1_46 = arith.constant 1 : index
    %c0_47 = arith.constant 0 : index
    %c2_48 = arith.constant 2 : index
    %78 = vector.load %arg7[%c1_46, %c0_47, %c2_48] : memref<4x18x18xf32, #tpu.memory_space<vmem>>, vector<1x16x16xf32>
    %79 = vector.shape_cast %78 : vector<1x16x16xf32> to vector<16x16xf32>
    %80 = vector.broadcast %77 : f32 to vector<16x16xf32>
    %81 = arith.mulf %79, %80 : vector<16x16xf32>
    %82 = arith.addf %76, %81 : vector<16x16xf32>
    %c12 = arith.constant 12 : index
    %83 = memref.load %arg2[%c12] : memref<36xf32, #tpu.memory_space<smem>>
    %c1_49 = arith.constant 1 : index
    %c1_50 = arith.constant 1 : index
    %c0_51 = arith.constant 0 : index
    %84 = vector.load %arg7[%c1_49, %c1_50, %c0_51] : memref<4x18x18xf32, #tpu.memory_space<vmem>>, vector<1x16x16xf32>
    %85 = vector.shape_cast %84 : vector<1x16x16xf32> to vector<16x16xf32>
    %86 = vector.broadcast %83 : f32 to vector<16x16xf32>
    %87 = arith.mulf %85, %86 : vector<16x16xf32>
    %88 = arith.addf %82, %87 : vector<16x16xf32>
    %c13 = arith.constant 13 : index
    %89 = memref.load %arg2[%c13] : memref<36xf32, #tpu.memory_space<smem>>
    %c1_52 = arith.constant 1 : index
    %c1_53 = arith.constant 1 : index
    %c1_54 = arith.constant 1 : index
    %90 = vector.load %arg7[%c1_52, %c1_53, %c1_54] : memref<4x18x18xf32, #tpu.memory_space<vmem>>, vector<1x16x16xf32>
    %91 = vector.shape_cast %90 : vector<1x16x16xf32> to vector<16x16xf32>
    %92 = vector.broadcast %89 : f32 to vector<16x16xf32>
    %93 = arith.mulf %91, %92 : vector<16x16xf32>
    %94 = arith.addf %88, %93 : vector<16x16xf32>
    %c14 = arith.constant 14 : index
    %95 = memref.load %arg2[%c14] : memref<36xf32, #tpu.memory_space<smem>>
    %c1_55 = arith.constant 1 : index
    %c1_56 = arith.constant 1 : index
    %c2_57 = arith.constant 2 : index
    %96 = vector.load %arg7[%c1_55, %c1_56, %c2_57] : memref<4x18x18xf32, #tpu.memory_space<vmem>>, vector<1x16x16xf32>
    %97 = vector.shape_cast %96 : vector<1x16x16xf32> to vector<16x16xf32>
    %98 = vector.broadcast %95 : f32 to vector<16x16xf32>
    %99 = arith.mulf %97, %98 : vector<16x16xf32>
    %100 = arith.addf %94, %99 : vector<16x16xf32>
    %c15 = arith.constant 15 : index
    %101 = memref.load %arg2[%c15] : memref<36xf32, #tpu.memory_space<smem>>
    %c1_58 = arith.constant 1 : index
    %c2_59 = arith.constant 2 : index
    %c0_60 = arith.constant 0 : index
    %102 = vector.load %arg7[%c1_58, %c2_59, %c0_60] : memref<4x18x18xf32, #tpu.memory_space<vmem>>, vector<1x16x16xf32>
    %103 = vector.shape_cast %102 : vector<1x16x16xf32> to vector<16x16xf32>
    %104 = vector.broadcast %101 : f32 to vector<16x16xf32>
    %105 = arith.mulf %103, %104 : vector<16x16xf32>
    %106 = arith.addf %100, %105 : vector<16x16xf32>
    %c16 = arith.constant 16 : index
    %107 = memref.load %arg2[%c16] : memref<36xf32, #tpu.memory_space<smem>>
    %c1_61 = arith.constant 1 : index
    %c2_62 = arith.constant 2 : index
    %c1_63 = arith.constant 1 : index
    %108 = vector.load %arg7[%c1_61, %c2_62, %c1_63] : memref<4x18x18xf32, #tpu.memory_space<vmem>>, vector<1x16x16xf32>
    %109 = vector.shape_cast %108 : vector<1x16x16xf32> to vector<16x16xf32>
    %110 = vector.broadcast %107 : f32 to vector<16x16xf32>
    %111 = arith.mulf %109, %110 : vector<16x16xf32>
    %112 = arith.addf %106, %111 : vector<16x16xf32>
    %c17 = arith.constant 17 : index
    %113 = memref.load %arg2[%c17] : memref<36xf32, #tpu.memory_space<smem>>
    %c1_64 = arith.constant 1 : index
    %c2_65 = arith.constant 2 : index
    %c2_66 = arith.constant 2 : index
    %114 = vector.load %arg7[%c1_64, %c2_65, %c2_66] : memref<4x18x18xf32, #tpu.memory_space<vmem>>, vector<1x16x16xf32>
    %115 = vector.shape_cast %114 : vector<1x16x16xf32> to vector<16x16xf32>
    %116 = vector.broadcast %113 : f32 to vector<16x16xf32>
    %117 = arith.mulf %115, %116 : vector<16x16xf32>
    %118 = arith.addf %112, %117 : vector<16x16xf32>
    %cst_67 = arith.constant 0.000000e+00 : f32
    %119 = vector.broadcast %cst_67 : f32 to vector<16x16xf32>
    %120 = arith.maximumf %118, %119 : vector<16x16xf32>
    %c2_68 = arith.constant 2 : index
    %121 = memref.load %arg3[%c2_68] : memref<4xf32, #tpu.memory_space<smem>>
    %122 = vector.broadcast %121 : f32 to vector<16x16xf32>
    %c18 = arith.constant 18 : index
    %123 = memref.load %arg2[%c18] : memref<36xf32, #tpu.memory_space<smem>>
    %c2_69 = arith.constant 2 : index
    %c0_70 = arith.constant 0 : index
    %c0_71 = arith.constant 0 : index
    %124 = vector.load %arg7[%c2_69, %c0_70, %c0_71] : memref<4x18x18xf32, #tpu.memory_space<vmem>>, vector<1x16x16xf32>
    %125 = vector.shape_cast %124 : vector<1x16x16xf32> to vector<16x16xf32>
    %126 = vector.broadcast %123 : f32 to vector<16x16xf32>
    %127 = arith.mulf %125, %126 : vector<16x16xf32>
    %128 = arith.addf %122, %127 : vector<16x16xf32>
    %c19 = arith.constant 19 : index
    %129 = memref.load %arg2[%c19] : memref<36xf32, #tpu.memory_space<smem>>
    %c2_72 = arith.constant 2 : index
    %c0_73 = arith.constant 0 : index
    %c1_74 = arith.constant 1 : index
    %130 = vector.load %arg7[%c2_72, %c0_73, %c1_74] : memref<4x18x18xf32, #tpu.memory_space<vmem>>, vector<1x16x16xf32>
    %131 = vector.shape_cast %130 : vector<1x16x16xf32> to vector<16x16xf32>
    %132 = vector.broadcast %129 : f32 to vector<16x16xf32>
    %133 = arith.mulf %131, %132 : vector<16x16xf32>
    %134 = arith.addf %128, %133 : vector<16x16xf32>
    %c20 = arith.constant 20 : index
    %135 = memref.load %arg2[%c20] : memref<36xf32, #tpu.memory_space<smem>>
    %c2_75 = arith.constant 2 : index
    %c0_76 = arith.constant 0 : index
    %c2_77 = arith.constant 2 : index
    %136 = vector.load %arg7[%c2_75, %c0_76, %c2_77] : memref<4x18x18xf32, #tpu.memory_space<vmem>>, vector<1x16x16xf32>
    %137 = vector.shape_cast %136 : vector<1x16x16xf32> to vector<16x16xf32>
    %138 = vector.broadcast %135 : f32 to vector<16x16xf32>
    %139 = arith.mulf %137, %138 : vector<16x16xf32>
    %140 = arith.addf %134, %139 : vector<16x16xf32>
    %c21 = arith.constant 21 : index
    %141 = memref.load %arg2[%c21] : memref<36xf32, #tpu.memory_space<smem>>
    %c2_78 = arith.constant 2 : index
    %c1_79 = arith.constant 1 : index
    %c0_80 = arith.constant 0 : index
    %142 = vector.load %arg7[%c2_78, %c1_79, %c0_80] : memref<4x18x18xf32, #tpu.memory_space<vmem>>, vector<1x16x16xf32>
    %143 = vector.shape_cast %142 : vector<1x16x16xf32> to vector<16x16xf32>
    %144 = vector.broadcast %141 : f32 to vector<16x16xf32>
    %145 = arith.mulf %143, %144 : vector<16x16xf32>
    %146 = arith.addf %140, %145 : vector<16x16xf32>
    %c22 = arith.constant 22 : index
    %147 = memref.load %arg2[%c22] : memref<36xf32, #tpu.memory_space<smem>>
    %c2_81 = arith.constant 2 : index
    %c1_82 = arith.constant 1 : index
    %c1_83 = arith.constant 1 : index
    %148 = vector.load %arg7[%c2_81, %c1_82, %c1_83] : memref<4x18x18xf32, #tpu.memory_space<vmem>>, vector<1x16x16xf32>
    %149 = vector.shape_cast %148 : vector<1x16x16xf32> to vector<16x16xf32>
    %150 = vector.broadcast %147 : f32 to vector<16x16xf32>
    %151 = arith.mulf %149, %150 : vector<16x16xf32>
    %152 = arith.addf %146, %151 : vector<16x16xf32>
    %c23 = arith.constant 23 : index
    %153 = memref.load %arg2[%c23] : memref<36xf32, #tpu.memory_space<smem>>
    %c2_84 = arith.constant 2 : index
    %c1_85 = arith.constant 1 : index
    %c2_86 = arith.constant 2 : index
    %154 = vector.load %arg7[%c2_84, %c1_85, %c2_86] : memref<4x18x18xf32, #tpu.memory_space<vmem>>, vector<1x16x16xf32>
    %155 = vector.shape_cast %154 : vector<1x16x16xf32> to vector<16x16xf32>
    %156 = vector.broadcast %153 : f32 to vector<16x16xf32>
    %157 = arith.mulf %155, %156 : vector<16x16xf32>
    %158 = arith.addf %152, %157 : vector<16x16xf32>
    %c24 = arith.constant 24 : index
    %159 = memref.load %arg2[%c24] : memref<36xf32, #tpu.memory_space<smem>>
    %c2_87 = arith.constant 2 : index
    %c2_88 = arith.constant 2 : index
    %c0_89 = arith.constant 0 : index
    %160 = vector.load %arg7[%c2_87, %c2_88, %c0_89] : memref<4x18x18xf32, #tpu.memory_space<vmem>>, vector<1x16x16xf32>
    %161 = vector.shape_cast %160 : vector<1x16x16xf32> to vector<16x16xf32>
    %162 = vector.broadcast %159 : f32 to vector<16x16xf32>
    %163 = arith.mulf %161, %162 : vector<16x16xf32>
    %164 = arith.addf %158, %163 : vector<16x16xf32>
    %c25 = arith.constant 25 : index
    %165 = memref.load %arg2[%c25] : memref<36xf32, #tpu.memory_space<smem>>
    %c2_90 = arith.constant 2 : index
    %c2_91 = arith.constant 2 : index
    %c1_92 = arith.constant 1 : index
    %166 = vector.load %arg7[%c2_90, %c2_91, %c1_92] : memref<4x18x18xf32, #tpu.memory_space<vmem>>, vector<1x16x16xf32>
    %167 = vector.shape_cast %166 : vector<1x16x16xf32> to vector<16x16xf32>
    %168 = vector.broadcast %165 : f32 to vector<16x16xf32>
    %169 = arith.mulf %167, %168 : vector<16x16xf32>
    %170 = arith.addf %164, %169 : vector<16x16xf32>
    %c26 = arith.constant 26 : index
    %171 = memref.load %arg2[%c26] : memref<36xf32, #tpu.memory_space<smem>>
    %c2_93 = arith.constant 2 : index
    %c2_94 = arith.constant 2 : index
    %c2_95 = arith.constant 2 : index
    %172 = vector.load %arg7[%c2_93, %c2_94, %c2_95] : memref<4x18x18xf32, #tpu.memory_space<vmem>>, vector<1x16x16xf32>
    %173 = vector.shape_cast %172 : vector<1x16x16xf32> to vector<16x16xf32>
    %174 = vector.broadcast %171 : f32 to vector<16x16xf32>
    %175 = arith.mulf %173, %174 : vector<16x16xf32>
    %176 = arith.addf %170, %175 : vector<16x16xf32>
    %cst_96 = arith.constant 0.000000e+00 : f32
    %177 = vector.broadcast %cst_96 : f32 to vector<16x16xf32>
    %178 = arith.maximumf %176, %177 : vector<16x16xf32>
    %c3_97 = arith.constant 3 : index
    %179 = memref.load %arg3[%c3_97] : memref<4xf32, #tpu.memory_space<smem>>
    %180 = vector.broadcast %179 : f32 to vector<16x16xf32>
    %c27 = arith.constant 27 : index
    %181 = memref.load %arg2[%c27] : memref<36xf32, #tpu.memory_space<smem>>
    %c3_98 = arith.constant 3 : index
    %c0_99 = arith.constant 0 : index
    %c0_100 = arith.constant 0 : index
    %182 = vector.load %arg7[%c3_98, %c0_99, %c0_100] : memref<4x18x18xf32, #tpu.memory_space<vmem>>, vector<1x16x16xf32>
    %183 = vector.shape_cast %182 : vector<1x16x16xf32> to vector<16x16xf32>
    %184 = vector.broadcast %181 : f32 to vector<16x16xf32>
    %185 = arith.mulf %183, %184 : vector<16x16xf32>
    %186 = arith.addf %180, %185 : vector<16x16xf32>
    %c28 = arith.constant 28 : index
    %187 = memref.load %arg2[%c28] : memref<36xf32, #tpu.memory_space<smem>>
    %c3_101 = arith.constant 3 : index
    %c0_102 = arith.constant 0 : index
    %c1_103 = arith.constant 1 : index
    %188 = vector.load %arg7[%c3_101, %c0_102, %c1_103] : memref<4x18x18xf32, #tpu.memory_space<vmem>>, vector<1x16x16xf32>
    %189 = vector.shape_cast %188 : vector<1x16x16xf32> to vector<16x16xf32>
    %190 = vector.broadcast %187 : f32 to vector<16x16xf32>
    %191 = arith.mulf %189, %190 : vector<16x16xf32>
    %192 = arith.addf %186, %191 : vector<16x16xf32>
    %c29 = arith.constant 29 : index
    %193 = memref.load %arg2[%c29] : memref<36xf32, #tpu.memory_space<smem>>
    %c3_104 = arith.constant 3 : index
    %c0_105 = arith.constant 0 : index
    %c2_106 = arith.constant 2 : index
    %194 = vector.load %arg7[%c3_104, %c0_105, %c2_106] : memref<4x18x18xf32, #tpu.memory_space<vmem>>, vector<1x16x16xf32>
    %195 = vector.shape_cast %194 : vector<1x16x16xf32> to vector<16x16xf32>
    %196 = vector.broadcast %193 : f32 to vector<16x16xf32>
    %197 = arith.mulf %195, %196 : vector<16x16xf32>
    %198 = arith.addf %192, %197 : vector<16x16xf32>
    %c30 = arith.constant 30 : index
    %199 = memref.load %arg2[%c30] : memref<36xf32, #tpu.memory_space<smem>>
    %c3_107 = arith.constant 3 : index
    %c1_108 = arith.constant 1 : index
    %c0_109 = arith.constant 0 : index
    %200 = vector.load %arg7[%c3_107, %c1_108, %c0_109] : memref<4x18x18xf32, #tpu.memory_space<vmem>>, vector<1x16x16xf32>
    %201 = vector.shape_cast %200 : vector<1x16x16xf32> to vector<16x16xf32>
    %202 = vector.broadcast %199 : f32 to vector<16x16xf32>
    %203 = arith.mulf %201, %202 : vector<16x16xf32>
    %204 = arith.addf %198, %203 : vector<16x16xf32>
    %c31 = arith.constant 31 : index
    %205 = memref.load %arg2[%c31] : memref<36xf32, #tpu.memory_space<smem>>
    %c3_110 = arith.constant 3 : index
    %c1_111 = arith.constant 1 : index
    %c1_112 = arith.constant 1 : index
    %206 = vector.load %arg7[%c3_110, %c1_111, %c1_112] : memref<4x18x18xf32, #tpu.memory_space<vmem>>, vector<1x16x16xf32>
    %207 = vector.shape_cast %206 : vector<1x16x16xf32> to vector<16x16xf32>
    %208 = vector.broadcast %205 : f32 to vector<16x16xf32>
    %209 = arith.mulf %207, %208 : vector<16x16xf32>
    %210 = arith.addf %204, %209 : vector<16x16xf32>
    %c32 = arith.constant 32 : index
    %211 = memref.load %arg2[%c32] : memref<36xf32, #tpu.memory_space<smem>>
    %c3_113 = arith.constant 3 : index
    %c1_114 = arith.constant 1 : index
    %c2_115 = arith.constant 2 : index
    %212 = vector.load %arg7[%c3_113, %c1_114, %c2_115] : memref<4x18x18xf32, #tpu.memory_space<vmem>>, vector<1x16x16xf32>
    %213 = vector.shape_cast %212 : vector<1x16x16xf32> to vector<16x16xf32>
    %214 = vector.broadcast %211 : f32 to vector<16x16xf32>
    %215 = arith.mulf %213, %214 : vector<16x16xf32>
    %216 = arith.addf %210, %215 : vector<16x16xf32>
    %c33 = arith.constant 33 : index
    %217 = memref.load %arg2[%c33] : memref<36xf32, #tpu.memory_space<smem>>
    %c3_116 = arith.constant 3 : index
    %c2_117 = arith.constant 2 : index
    %c0_118 = arith.constant 0 : index
    %218 = vector.load %arg7[%c3_116, %c2_117, %c0_118] : memref<4x18x18xf32, #tpu.memory_space<vmem>>, vector<1x16x16xf32>
    %219 = vector.shape_cast %218 : vector<1x16x16xf32> to vector<16x16xf32>
    %220 = vector.broadcast %217 : f32 to vector<16x16xf32>
    %221 = arith.mulf %219, %220 : vector<16x16xf32>
    %222 = arith.addf %216, %221 : vector<16x16xf32>
    %c34 = arith.constant 34 : index
    %223 = memref.load %arg2[%c34] : memref<36xf32, #tpu.memory_space<smem>>
    %c3_119 = arith.constant 3 : index
    %c2_120 = arith.constant 2 : index
    %c1_121 = arith.constant 1 : index
    %224 = vector.load %arg7[%c3_119, %c2_120, %c1_121] : memref<4x18x18xf32, #tpu.memory_space<vmem>>, vector<1x16x16xf32>
    %225 = vector.shape_cast %224 : vector<1x16x16xf32> to vector<16x16xf32>
    %226 = vector.broadcast %223 : f32 to vector<16x16xf32>
    %227 = arith.mulf %225, %226 : vector<16x16xf32>
    %228 = arith.addf %222, %227 : vector<16x16xf32>
    %c35 = arith.constant 35 : index
    %229 = memref.load %arg2[%c35] : memref<36xf32, #tpu.memory_space<smem>>
    %c3_122 = arith.constant 3 : index
    %c2_123 = arith.constant 2 : index
    %c2_124 = arith.constant 2 : index
    %230 = vector.load %arg7[%c3_122, %c2_123, %c2_124] : memref<4x18x18xf32, #tpu.memory_space<vmem>>, vector<1x16x16xf32>
    %231 = vector.shape_cast %230 : vector<1x16x16xf32> to vector<16x16xf32>
    %232 = vector.broadcast %229 : f32 to vector<16x16xf32>
    %233 = arith.mulf %231, %232 : vector<16x16xf32>
    %234 = arith.addf %228, %233 : vector<16x16xf32>
    %cst_125 = arith.constant 0.000000e+00 : f32
    %235 = vector.broadcast %cst_125 : f32 to vector<16x16xf32>
    %236 = arith.maximumf %234, %235 : vector<16x16xf32>
    %c0_126 = arith.constant 0 : index
    %237 = memref.load %arg5[%c0_126] : memref<8xf32, #tpu.memory_space<smem>>
    %238 = vector.broadcast %237 : f32 to vector<16x16xf32>
    %c0_127 = arith.constant 0 : index
    %239 = memref.load %arg4[%c0_127] : memref<32xf32, #tpu.memory_space<smem>>
    %240 = vector.broadcast %239 : f32 to vector<16x16xf32>
    %241 = arith.mulf %62, %240 : vector<16x16xf32>
    %242 = arith.addf %238, %241 : vector<16x16xf32>
    %c1_128 = arith.constant 1 : index
    %243 = memref.load %arg4[%c1_128] : memref<32xf32, #tpu.memory_space<smem>>
    %244 = vector.broadcast %243 : f32 to vector<16x16xf32>
    %245 = arith.mulf %120, %244 : vector<16x16xf32>
    %246 = arith.addf %242, %245 : vector<16x16xf32>
    %c2_129 = arith.constant 2 : index
    %247 = memref.load %arg4[%c2_129] : memref<32xf32, #tpu.memory_space<smem>>
    %248 = vector.broadcast %247 : f32 to vector<16x16xf32>
    %249 = arith.mulf %178, %248 : vector<16x16xf32>
    %250 = arith.addf %246, %249 : vector<16x16xf32>
    %c3_130 = arith.constant 3 : index
    %251 = memref.load %arg4[%c3_130] : memref<32xf32, #tpu.memory_space<smem>>
    %252 = vector.broadcast %251 : f32 to vector<16x16xf32>
    %253 = arith.mulf %236, %252 : vector<16x16xf32>
    %254 = arith.addf %250, %253 : vector<16x16xf32>
    %c0_131 = arith.constant 0 : index
    %c0_132 = arith.constant 0 : index
    %c0_133 = arith.constant 0 : index
    %c0_134 = arith.constant 0 : index
    %255 = vector.load %arg6[%c0_131, %c0_132, %c0_133, %c0_134] : memref<1x8x16x16xf32, #tpu.memory_space<vmem>>, vector<1x1x16x16xf32>
    %256 = vector.shape_cast %255 : vector<1x1x16x16xf32> to vector<16x16xf32>
    %257 = vector.shape_cast %254 : vector<16x16xf32> to vector<1x1x16x16xf32>
    tpu.vector_store %arg6[%c0_131, %c0_132, %c0_133, %c0_134], %257 {strides = array<i32>} : memref<1x8x16x16xf32, #tpu.memory_space<vmem>>, vector<1x1x16x16xf32>,
    %c1_135 = arith.constant 1 : index
    %258 = memref.load %arg5[%c1_135] : memref<8xf32, #tpu.memory_space<smem>>
    %259 = vector.broadcast %258 : f32 to vector<16x16xf32>
    %c4_136 = arith.constant 4 : index
    %260 = memref.load %arg4[%c4_136] : memref<32xf32, #tpu.memory_space<smem>>
    %261 = vector.broadcast %260 : f32 to vector<16x16xf32>
    %262 = arith.mulf %62, %261 : vector<16x16xf32>
    %263 = arith.addf %259, %262 : vector<16x16xf32>
    %c5_137 = arith.constant 5 : index
    %264 = memref.load %arg4[%c5_137] : memref<32xf32, #tpu.memory_space<smem>>
    %265 = vector.broadcast %264 : f32 to vector<16x16xf32>
    %266 = arith.mulf %120, %265 : vector<16x16xf32>
    %267 = arith.addf %263, %266 : vector<16x16xf32>
    %c6_138 = arith.constant 6 : index
    %268 = memref.load %arg4[%c6_138] : memref<32xf32, #tpu.memory_space<smem>>
    %269 = vector.broadcast %268 : f32 to vector<16x16xf32>
    %270 = arith.mulf %178, %269 : vector<16x16xf32>
    %271 = arith.addf %267, %270 : vector<16x16xf32>
    %c7_139 = arith.constant 7 : index
    %272 = memref.load %arg4[%c7_139] : memref<32xf32, #tpu.memory_space<smem>>
    %273 = vector.broadcast %272 : f32 to vector<16x16xf32>
    %274 = arith.mulf %236, %273 : vector<16x16xf32>
    %275 = arith.addf %271, %274 : vector<16x16xf32>
    %c0_140 = arith.constant 0 : index
    %c1_141 = arith.constant 1 : index
    %c0_142 = arith.constant 0 : index
    %c0_143 = arith.constant 0 : index
    %276 = vector.load %arg6[%c0_140, %c1_141, %c0_142, %c0_143] : memref<1x8x16x16xf32, #tpu.memory_space<vmem>>, vector<1x1x16x16xf32>
    %277 = vector.shape_cast %276 : vector<1x1x16x16xf32> to vector<16x16xf32>
    %278 = vector.shape_cast %275 : vector<16x16xf32> to vector<1x1x16x16xf32>
    tpu.vector_store %arg6[%c0_140, %c1_141, %c0_142, %c0_143], %278 {strides = array<i32>} : memref<1x8x16x16xf32, #tpu.memory_space<vmem>>, vector<1x1x16x16xf32>,
    %c2_144 = arith.constant 2 : index
    %279 = memref.load %arg5[%c2_144] : memref<8xf32, #tpu.memory_space<smem>>
    %280 = vector.broadcast %279 : f32 to vector<16x16xf32>
    %c8_145 = arith.constant 8 : index
    %281 = memref.load %arg4[%c8_145] : memref<32xf32, #tpu.memory_space<smem>>
    %282 = vector.broadcast %281 : f32 to vector<16x16xf32>
    %283 = arith.mulf %62, %282 : vector<16x16xf32>
    %284 = arith.addf %280, %283 : vector<16x16xf32>
    %c9_146 = arith.constant 9 : index
    %285 = memref.load %arg4[%c9_146] : memref<32xf32, #tpu.memory_space<smem>>
    %286 = vector.broadcast %285 : f32 to vector<16x16xf32>
    %287 = arith.mulf %120, %286 : vector<16x16xf32>
    %288 = arith.addf %284, %287 : vector<16x16xf32>
    %c10_147 = arith.constant 10 : index
    %289 = memref.load %arg4[%c10_147] : memref<32xf32, #tpu.memory_space<smem>>
    %290 = vector.broadcast %289 : f32 to vector<16x16xf32>
    %291 = arith.mulf %178, %290 : vector<16x16xf32>
    %292 = arith.addf %288, %291 : vector<16x16xf32>
    %c11_148 = arith.constant 11 : index
    %293 = memref.load %arg4[%c11_148] : memref<32xf32, #tpu.memory_space<smem>>
    %294 = vector.broadcast %293 : f32 to vector<16x16xf32>
    %295 = arith.mulf %236, %294 : vector<16x16xf32>
    %296 = arith.addf %292, %295 : vector<16x16xf32>
    %c0_149 = arith.constant 0 : index
    %c2_150 = arith.constant 2 : index
    %c0_151 = arith.constant 0 : index
    %c0_152 = arith.constant 0 : index
    %297 = vector.load %arg6[%c0_149, %c2_150, %c0_151, %c0_152] : memref<1x8x16x16xf32, #tpu.memory_space<vmem>>, vector<1x1x16x16xf32>
    %298 = vector.shape_cast %297 : vector<1x1x16x16xf32> to vector<16x16xf32>
    %299 = vector.shape_cast %296 : vector<16x16xf32> to vector<1x1x16x16xf32>
    tpu.vector_store %arg6[%c0_149, %c2_150, %c0_151, %c0_152], %299 {strides = array<i32>} : memref<1x8x16x16xf32, #tpu.memory_space<vmem>>, vector<1x1x16x16xf32>,
    %c3_153 = arith.constant 3 : index
    %300 = memref.load %arg5[%c3_153] : memref<8xf32, #tpu.memory_space<smem>>
    %301 = vector.broadcast %300 : f32 to vector<16x16xf32>
    %c12_154 = arith.constant 12 : index
    %302 = memref.load %arg4[%c12_154] : memref<32xf32, #tpu.memory_space<smem>>
    %303 = vector.broadcast %302 : f32 to vector<16x16xf32>
    %304 = arith.mulf %62, %303 : vector<16x16xf32>
    %305 = arith.addf %301, %304 : vector<16x16xf32>
    %c13_155 = arith.constant 13 : index
    %306 = memref.load %arg4[%c13_155] : memref<32xf32, #tpu.memory_space<smem>>
    %307 = vector.broadcast %306 : f32 to vector<16x16xf32>
    %308 = arith.mulf %120, %307 : vector<16x16xf32>
    %309 = arith.addf %305, %308 : vector<16x16xf32>
    %c14_156 = arith.constant 14 : index
    %310 = memref.load %arg4[%c14_156] : memref<32xf32, #tpu.memory_space<smem>>
    %311 = vector.broadcast %310 : f32 to vector<16x16xf32>
    %312 = arith.mulf %178, %311 : vector<16x16xf32>
    %313 = arith.addf %309, %312 : vector<16x16xf32>
    %c15_157 = arith.constant 15 : index
    %314 = memref.load %arg4[%c15_157] : memref<32xf32, #tpu.memory_space<smem>>
    %315 = vector.broadcast %314 : f32 to vector<16x16xf32>
    %316 = arith.mulf %236, %315 : vector<16x16xf32>
    %317 = arith.addf %313, %316 : vector<16x16xf32>
    %c0_158 = arith.constant 0 : index
    %c3_159 = arith.constant 3 : index
    %c0_160 = arith.constant 0 : index
    %c0_161 = arith.constant 0 : index
    %318 = vector.load %arg6[%c0_158, %c3_159, %c0_160, %c0_161] : memref<1x8x16x16xf32, #tpu.memory_space<vmem>>, vector<1x1x16x16xf32>
    %319 = vector.shape_cast %318 : vector<1x1x16x16xf32> to vector<16x16xf32>
    %320 = vector.shape_cast %317 : vector<16x16xf32> to vector<1x1x16x16xf32>
    tpu.vector_store %arg6[%c0_158, %c3_159, %c0_160, %c0_161], %320 {strides = array<i32>} : memref<1x8x16x16xf32, #tpu.memory_space<vmem>>, vector<1x1x16x16xf32>,
    %c4_162 = arith.constant 4 : index
    %321 = memref.load %arg5[%c4_162] : memref<8xf32, #tpu.memory_space<smem>>
    %322 = vector.broadcast %321 : f32 to vector<16x16xf32>
    %c16_163 = arith.constant 16 : index
    %323 = memref.load %arg4[%c16_163] : memref<32xf32, #tpu.memory_space<smem>>
    %324 = vector.broadcast %323 : f32 to vector<16x16xf32>
    %325 = arith.mulf %62, %324 : vector<16x16xf32>
    %326 = arith.addf %322, %325 : vector<16x16xf32>
    %c17_164 = arith.constant 17 : index
    %327 = memref.load %arg4[%c17_164] : memref<32xf32, #tpu.memory_space<smem>>
    %328 = vector.broadcast %327 : f32 to vector<16x16xf32>
    %329 = arith.mulf %120, %328 : vector<16x16xf32>
    %330 = arith.addf %326, %329 : vector<16x16xf32>
    %c18_165 = arith.constant 18 : index
    %331 = memref.load %arg4[%c18_165] : memref<32xf32, #tpu.memory_space<smem>>
    %332 = vector.broadcast %331 : f32 to vector<16x16xf32>
    %333 = arith.mulf %178, %332 : vector<16x16xf32>
    %334 = arith.addf %330, %333 : vector<16x16xf32>
    %c19_166 = arith.constant 19 : index
    %335 = memref.load %arg4[%c19_166] : memref<32xf32, #tpu.memory_space<smem>>
    %336 = vector.broadcast %335 : f32 to vector<16x16xf32>
    %337 = arith.mulf %236, %336 : vector<16x16xf32>
    %338 = arith.addf %334, %337 : vector<16x16xf32>
    %c0_167 = arith.constant 0 : index
    %c4_168 = arith.constant 4 : index
    %c0_169 = arith.constant 0 : index
    %c0_170 = arith.constant 0 : index
    %339 = vector.load %arg6[%c0_167, %c4_168, %c0_169, %c0_170] : memref<1x8x16x16xf32, #tpu.memory_space<vmem>>, vector<1x1x16x16xf32>
    %340 = vector.shape_cast %339 : vector<1x1x16x16xf32> to vector<16x16xf32>
    %341 = vector.shape_cast %338 : vector<16x16xf32> to vector<1x1x16x16xf32>
    tpu.vector_store %arg6[%c0_167, %c4_168, %c0_169, %c0_170], %341 {strides = array<i32>} : memref<1x8x16x16xf32, #tpu.memory_space<vmem>>, vector<1x1x16x16xf32>,
    %c5_171 = arith.constant 5 : index
    %342 = memref.load %arg5[%c5_171] : memref<8xf32, #tpu.memory_space<smem>>
    %343 = vector.broadcast %342 : f32 to vector<16x16xf32>
    %c20_172 = arith.constant 20 : index
    %344 = memref.load %arg4[%c20_172] : memref<32xf32, #tpu.memory_space<smem>>
    %345 = vector.broadcast %344 : f32 to vector<16x16xf32>
    %346 = arith.mulf %62, %345 : vector<16x16xf32>
    %347 = arith.addf %343, %346 : vector<16x16xf32>
    %c21_173 = arith.constant 21 : index
    %348 = memref.load %arg4[%c21_173] : memref<32xf32, #tpu.memory_space<smem>>
    %349 = vector.broadcast %348 : f32 to vector<16x16xf32>
    %350 = arith.mulf %120, %349 : vector<16x16xf32>
    %351 = arith.addf %347, %350 : vector<16x16xf32>
    %c22_174 = arith.constant 22 : index
    %352 = memref.load %arg4[%c22_174] : memref<32xf32, #tpu.memory_space<smem>>
    %353 = vector.broadcast %352 : f32 to vector<16x16xf32>
    %354 = arith.mulf %178, %353 : vector<16x16xf32>
    %355 = arith.addf %351, %354 : vector<16x16xf32>
    %c23_175 = arith.constant 23 : index
    %356 = memref.load %arg4[%c23_175] : memref<32xf32, #tpu.memory_space<smem>>
    %357 = vector.broadcast %356 : f32 to vector<16x16xf32>
    %358 = arith.mulf %236, %357 : vector<16x16xf32>
    %359 = arith.addf %355, %358 : vector<16x16xf32>
    %c0_176 = arith.constant 0 : index
    %c5_177 = arith.constant 5 : index
    %c0_178 = arith.constant 0 : index
    %c0_179 = arith.constant 0 : index
    %360 = vector.load %arg6[%c0_176, %c5_177, %c0_178, %c0_179] : memref<1x8x16x16xf32, #tpu.memory_space<vmem>>, vector<1x1x16x16xf32>
    %361 = vector.shape_cast %360 : vector<1x1x16x16xf32> to vector<16x16xf32>
    %362 = vector.shape_cast %359 : vector<16x16xf32> to vector<1x1x16x16xf32>
    tpu.vector_store %arg6[%c0_176, %c5_177, %c0_178, %c0_179], %362 {strides = array<i32>} : memref<1x8x16x16xf32, #tpu.memory_space<vmem>>, vector<1x1x16x16xf32>,
    %c6_180 = arith.constant 6 : index
    %363 = memref.load %arg5[%c6_180] : memref<8xf32, #tpu.memory_space<smem>>
    %364 = vector.broadcast %363 : f32 to vector<16x16xf32>
    %c24_181 = arith.constant 24 : index
    %365 = memref.load %arg4[%c24_181] : memref<32xf32, #tpu.memory_space<smem>>
    %366 = vector.broadcast %365 : f32 to vector<16x16xf32>
    %367 = arith.mulf %62, %366 : vector<16x16xf32>
    %368 = arith.addf %364, %367 : vector<16x16xf32>
    %c25_182 = arith.constant 25 : index
    %369 = memref.load %arg4[%c25_182] : memref<32xf32, #tpu.memory_space<smem>>
    %370 = vector.broadcast %369 : f32 to vector<16x16xf32>
    %371 = arith.mulf %120, %370 : vector<16x16xf32>
    %372 = arith.addf %368, %371 : vector<16x16xf32>
    %c26_183 = arith.constant 26 : index
    %373 = memref.load %arg4[%c26_183] : memref<32xf32, #tpu.memory_space<smem>>
    %374 = vector.broadcast %373 : f32 to vector<16x16xf32>
    %375 = arith.mulf %178, %374 : vector<16x16xf32>
    %376 = arith.addf %372, %375 : vector<16x16xf32>
    %c27_184 = arith.constant 27 : index
    %377 = memref.load %arg4[%c27_184] : memref<32xf32, #tpu.memory_space<smem>>
    %378 = vector.broadcast %377 : f32 to vector<16x16xf32>
    %379 = arith.mulf %236, %378 : vector<16x16xf32>
    %380 = arith.addf %376, %379 : vector<16x16xf32>
    %c0_185 = arith.constant 0 : index
    %c6_186 = arith.constant 6 : index
    %c0_187 = arith.constant 0 : index
    %c0_188 = arith.constant 0 : index
    %381 = vector.load %arg6[%c0_185, %c6_186, %c0_187, %c0_188] : memref<1x8x16x16xf32, #tpu.memory_space<vmem>>, vector<1x1x16x16xf32>
    %382 = vector.shape_cast %381 : vector<1x1x16x16xf32> to vector<16x16xf32>
    %383 = vector.shape_cast %380 : vector<16x16xf32> to vector<1x1x16x16xf32>
    tpu.vector_store %arg6[%c0_185, %c6_186, %c0_187, %c0_188], %383 {strides = array<i32>} : memref<1x8x16x16xf32, #tpu.memory_space<vmem>>, vector<1x1x16x16xf32>,
    %c7_189 = arith.constant 7 : index
    %384 = memref.load %arg5[%c7_189] : memref<8xf32, #tpu.memory_space<smem>>
    %385 = vector.broadcast %384 : f32 to vector<16x16xf32>
    %c28_190 = arith.constant 28 : index
    %386 = memref.load %arg4[%c28_190] : memref<32xf32, #tpu.memory_space<smem>>
    %387 = vector.broadcast %386 : f32 to vector<16x16xf32>
    %388 = arith.mulf %62, %387 : vector<16x16xf32>
    %389 = arith.addf %385, %388 : vector<16x16xf32>
    %c29_191 = arith.constant 29 : index
    %390 = memref.load %arg4[%c29_191] : memref<32xf32, #tpu.memory_space<smem>>
    %391 = vector.broadcast %390 : f32 to vector<16x16xf32>
    %392 = arith.mulf %120, %391 : vector<16x16xf32>
    %393 = arith.addf %389, %392 : vector<16x16xf32>
    %c30_192 = arith.constant 30 : index
    %394 = memref.load %arg4[%c30_192] : memref<32xf32, #tpu.memory_space<smem>>
    %395 = vector.broadcast %394 : f32 to vector<16x16xf32>
    %396 = arith.mulf %178, %395 : vector<16x16xf32>
    %397 = arith.addf %393, %396 : vector<16x16xf32>
    %c31_193 = arith.constant 31 : index
    %398 = memref.load %arg4[%c31_193] : memref<32xf32, #tpu.memory_space<smem>>
    %399 = vector.broadcast %398 : f32 to vector<16x16xf32>
    %400 = arith.mulf %236, %399 : vector<16x16xf32>
    %401 = arith.addf %397, %400 : vector<16x16xf32>
    %c0_194 = arith.constant 0 : index
    %c7_195 = arith.constant 7 : index
    %c0_196 = arith.constant 0 : index
    %c0_197 = arith.constant 0 : index
    %402 = vector.load %arg6[%c0_194, %c7_195, %c0_196, %c0_197] : memref<1x8x16x16xf32, #tpu.memory_space<vmem>>, vector<1x1x16x16xf32>
    %403 = vector.shape_cast %402 : vector<1x1x16x16xf32> to vector<16x16xf32>
    %404 = vector.shape_cast %401 : vector<16x16xf32> to vector<1x1x16x16xf32>
    tpu.vector_store %arg6[%c0_194, %c7_195, %c0_196, %c0_197], %404 {strides = array<i32>} : memref<1x8x16x16xf32, #tpu.memory_space<vmem>>, vector<1x1x16x16xf32>,
    return
  }
  func.func @transform_0(%arg0: i32) -> (i32, i32, i32, i32) {
    %c0_i32 = arith.constant 0 : i32
    %c0_i32_0 = arith.constant 0 : i32
    %c0_i32_1 = arith.constant 0 : i32
    %c0_i32_2 = arith.constant 0 : i32
    return %arg0, %c0_i32, %c0_i32_0, %c0_i32_1 : i32, i32, i32, i32
  }
  func.func @transform_1(%arg0: i32) -> i32 {
    %c0_i32 = arith.constant 0 : i32
    %c0_i32_0 = arith.constant 0 : i32
    return %c0_i32 : i32
  }
  func.func @transform_2(%arg0: i32) -> i32 {
    %c0_i32 = arith.constant 0 : i32
    %c0_i32_0 = arith.constant 0 : i32
    return %c0_i32 : i32
  }
  func.func @transform_3(%arg0: i32) -> i32 {
    %c0_i32 = arith.constant 0 : i32
    %c0_i32_0 = arith.constant 0 : i32
    return %c0_i32 : i32
  }
  func.func @transform_4(%arg0: i32) -> i32 {
    %c0_i32 = arith.constant 0 : i32
    %c0_i32_0 = arith.constant 0 : i32
    return %c0_i32 : i32
  }
  func.func @transform_5(%arg0: i32) -> (i32, i32, i32, i32) {
    %c0_i32 = arith.constant 0 : i32
    %c0_i32_0 = arith.constant 0 : i32
    %c0_i32_1 = arith.constant 0 : i32
    %c0_i32_2 = arith.constant 0 : i32
    return %arg0, %c0_i32, %c0_i32_0, %c0_i32_1 : i32, i32, i32, i32
  }
}

</mosaic_0001>

<bundles_post_ra>
// kernel: sep_conv2d_forward.1
= control target key start
LH: loop header
LB: loop body
LE: loop exit
PB: predicated region body
PF: predicated region fallthrough
CT: control target
= control target key end

     0   :  { %s2345_s0 = inlined_call_operand.hbm [shape: f32[2,4,16,16], index: 0, kind: input, shape index: {}]   ;;  %s2346_s1 = inlined_call_operand.vmem [shape: f32[36], index: 1, kind: input, shape index: {}]   ;;  %s2347_s2 = inlined_call_operand.vmem [shape: f32[4], index: 2, kind: input, shape index: {}]   ;;  %s2348_s3 = inlined_call_operand.vmem [shape: f32[32], index: 3, kind: input, shape index: {}]   ;;  %s2349_s4 = inlined_call_operand.vmem [shape: f32[8], index: 4, kind: input, shape index: {}]   ;;  %s2350_s5 = inlined_call_operand.hbm [shape: f32[2,8,16,16], index: 5, kind: output, shape index: {}]  }
   0x1   :  { %2361 = sst [smem:[#allocation25_spill]] %s2345_s0 }
   0x2   :  { %2362 = sst [smem:[#allocation26_spill]] %s2346_s1 }
   0x3   :  { %2363 = sst [smem:[#allocation27_spill]] %s2347_s2 }
   0x4   :  { %2364 = sst [smem:[#allocation28_spill]] %s2348_s3 }
   0x5   :  { %2365 = sst [smem:[#allocation29_spill]] %s2349_s4 }
   0x6   :  { %10 = vsyncpa [#allocation4], 0 }
   0x7   :  { %12 = vsyncpa [#allocation4 + $0x1], 0 }
   0x8   :  { %13 = vsyncpa [#allocation6], 0 }
   0x9   :  { %14 = vsyncpa [#allocation9], 0 }
   0xa   :  { %15 = vsyncpa [#allocation12], 0 }
   0xb   :  { %16 = vsyncpa [#allocation5], 0 }
   0xc   :  { %18 = vsyncpa [#allocation5 + $0x1], 0  ;;  %s1588_s18 = smov 0   ;;  %s1590_s19 = smov 0  }
   0xd   :  { %s1592_s20 = smov 0   ;;  %s1594_s21 = smov 0  }
   0xe LB: > { %2366 = sst [smem:[#allocation19_spill]] %s1534_s19  ;;  %s1609_s22 = sadd.s32 4294967295, %s1542_s21   ;;  %s1542_s21 = sphi %s1594_s21, %s2397_s21   ;;  %s1538_s20 = sphi %s1592_s20, %s2400_s20   ;;  %s1534_s19 = sphi %s1590_s19, %s2399_s19   ;;  %s1530_s18 = sphi %s1588_s18, %s2398_s18  }
   0xf   : > { %2367 = sst [smem:[#allocation20_spill]] %s1538_s20  ;;  %s1169_s23 = sadd.s32 4294967294, %s1542_s21  }
  0x10   : > { %2368 = sst [smem:[#allocation21_spill]] %s1542_s21  ;;  %p44_p0 = scmp.ne.s32.totalorder %s1534_s19, %s1530_s18 }
  0x11   : > { %p2351_p1 = scmp.eq.s32.totalorder %s1609_s22, 0  ;;  %p158_p3 = scmp.eq.s32.totalorder %s1169_s23, 1 }
  0x12   : > { %p1170_p5 = scmp.ge.s32.totalorder %s1542_s21, 1  ;;  %p165_p7 = scmp.lt.s32.totalorder %s1542_s21, 3 }
  0x13   : > { %p1618_p4 = por %p2351_p1, %p44_p0  ;;  %p1623_p6 = por %p158_p3, %p44_p0 }
  0x14   : > { %s2372_s2 = sld [smem:[#allocation27_spill]]  ;;  %p1631_p8 = pnand %p1170_p5, %p165_p7 }
  0x15   : > { %s2369_s24 = scalar_select %p1618_p4, 1, 0 }
  0x16   : > { %s2370_s25 = scalar_select %p1623_p6, 1, 0 }
  0x17   : > { %s2373_s29 = scalar_select %p1631_p8, 1, 0 }
  0x18   : > { %2371 = sst [smem:[#allocation22_spill]] %s2370_s25  ;;  %p1303_p10 = pneg %p1631_p8 }
  0x19   : > { %s2374_s1 = sld [smem:[#allocation26_spill]] }
  0x1a   : > { %s189_s28 = sshll.u32 %s2372_s2, 4  ;;  %p1643_p11 = pnand %p1303_p10, %p2351_p1  ;;  %s190_s28 = int_to_ptr.vmem [resolvable:$true] %s189_s28 }
  0x1b   : > { %s2376_s3 = sld [smem:[#allocation28_spill]]  ;;  %s1378_s15 = scalar_lea.vmem %s190_s28, 16 }
  0x1c   : > { %s2377_s4 = sld [smem:[#allocation29_spill]]  ;;  %p1379_p12 = scmp.ne.s32.totalorder %s190_s28, %s1378_s15 }
  0x1d   : > { %p1380_p13 = pneg %p1643_p11  ;;  %p1386_p5 = scmp.lt.s32.totalorder %s190_s28, %s190_s28 }
  0x1e   : > { %p1387_p7 = scmp.lt.s32.totalorder %s1378_s15, %s1378_s15 }
  0x1f   : > { %s178_s7 = sshll.u32 %s2374_s1, 4  ;;  %p1381_p0 = pnand %p1380_p13, %p1379_p12  ;;  %s179_s7 = int_to_ptr.vmem [resolvable:$true] %s178_s7 }
  0x20   : > { %p1388_p10 = por %p1387_p7, %p1386_p5 }
  0x21   : > { %s200_s11 = sshll.u32 %s2376_s3, 4  ;;  %p1382_p3 = pneg %p1381_p0  ;;  %s1650_s11 = int_to_ptr.vmem [resolvable:$true] %s200_s11 }
  0x22   : > { %s211_s14 = sshll.u32 %s2377_s4, 4  ;;  %s212_s14 = int_to_ptr.vmem [resolvable:$true] %s211_s14 }
  0x23   : > { %p1389_p9 = pnand %p1388_p10, %p1382_p3 }
  0x25   : > { %1392 = shalt.err (!%p1389_p9)
}
  0x26   : > { %s1544_s16 = smov [#allocation8]   ;;  %s1393_s17 = scalar_lea.vmem %s179_s7, 16 }
  0x27   : > { %1309 = dma.vmem_to_smem (!%p1643_p11), %s190_s28, 16, %s1544_s16, [#allocation9]  }
  0x28   : > { %p1394_p1 = scmp.ne.s32.totalorder %s179_s7, %s1393_s17  ;;  %p1401_p4 = scmp.lt.s32.totalorder %s179_s7, %s179_s7 }
  0x29   : > { %p1402_p8 = scmp.lt.s32.totalorder %s1393_s17, %s1393_s17 }
  0x2a   : > { %p1396_p2 = pnand %p1394_p1, %p1380_p13 }
  0x2b   : > { %p1403_p12 = por %p1402_p8, %p1401_p4 }
  0x2c   : > { %p1397_p6 = pneg %p1396_p2 }
  0x2e   : > { %p1404_p0 = pnand %p1403_p12, %p1397_p6 }
  0x30   : > { %1407 = shalt.err (!%p1404_p0)
}
  0x31   : > { %s1545_s23 = smov [#allocation7]   ;;  %s1408_s26 = scalar_lea.vmem %s1650_s11, 16 }
  0x32   : > { %1306 = dma.vmem_to_smem (!%p1643_p11), %s179_s7, 16, %s1545_s23, [#allocation6]  }
  0x33   : > { %p1409_p9 = scmp.ne.s32.totalorder %s1650_s11, %s1408_s26  ;;  %p1416_p2 = scmp.lt.s32.totalorder %s1650_s11, %s1650_s11 }
  0x34   : > { %p1417_p5 = scmp.lt.s32.totalorder %s1408_s26, %s1408_s26 }
  0x35   : > { %p1411_p3 = pnand %p1409_p9, %p1380_p13 }
  0x36   : > { %p1418_p4 = por %p1417_p5, %p1416_p2 }
  0x37   : > { %p1412_p1 = pneg %p1411_p3 }
  0x39   : > { %p1419_p6 = pnand %p1418_p4, %p1412_p1 }
  0x3b   : > { %1422 = shalt.err (!%p1419_p6)
}
  0x3c   : > { %s1546_s27 = smov [#allocation10]   ;;  %s1423_s6 = scalar_lea.vmem %s212_s14, 16 }
  0x3d   : > { %1312 = dma.vmem_to_smem (!%p1643_p11), %s1650_s11, 16, %s1546_s27, [#allocation9]  }
  0x3e   : > { %p1424_p8 = scmp.ne.s32.totalorder %s212_s14, %s1423_s6  ;;  %p1431_p12 = scmp.lt.s32.totalorder %s212_s14, %s212_s14 }
  0x3f   : > { %p1432_p0 = scmp.lt.s32.totalorder %s1423_s6, %s1423_s6 }
  0x40   : > { %p1426_p7 = pnand %p1424_p8, %p1380_p13 }
  0x41   : > { %p1433_p9 = por %p1432_p0, %p1431_p12 }
  0x42   : > { %p1427_p10 = pneg %p1426_p7 }
  0x44   : > { %p1434_p3 = pnand %p1433_p9, %p1427_p10 }
  0x46   : > { %1437 = shalt.err (!%p1434_p3)
}
  0x47   : > { %s1547_s7 = smov [#allocation11]   ;;  %s1687_s9 = sadd.s32 1, %s1542_s21  }
  0x48   : > { %1315 = dma.vmem_to_smem (!%p1643_p11), %s212_s14, 16, %s1547_s7, [#allocation12]  }
  0x49   : > { %2378 = sst [smem:[#allocation23_spill]] %s1687_s9  ;;  %s28_s10 = ssub.s32 %s1542_s21, %s1687_s9 }
  0x4a   : > { %p29_p13 = scmp.eq.s32.totalorder %s28_s10, 0  ;;  %s31_s11 = sadd.s32 1, %s1538_s20 }
  0x4b   : > { %p38_p1 = scmp.ne.s32.totalorder %s1538_s20, %s1534_s19  ;;  %p39_p2 = scmp.eq.s32.totalorder %s1542_s21, 0 }
  0x4c   : > { %s1696_s8 = scalar_select %p29_p13, %s1538_s20, %s31_s11  }
  0x4d   : > { %p40_p5 = por %p39_p2, %p38_p1  ;;  %p2380_p4 = scmp.eq.s32.totalorder %s1609_s22, 1 }
  0x4e   : > { %2379 = sst [smem:[#allocation24_spill]] %s1696_s8  ;;  %p1328_p8 = scmp.lt.s32.totalorder %s1542_s21, 2 }
  0x4f   : > { %p1700_p6 = por %p2380_p4, %p38_p1  ;;  %s222_s13 = sand.u32 1, %s1538_s20  }
  0x50   : > { %s1176_s15 = sshll.u32 %s222_s13, 6  ;;  %s1281_s14 = sshll.u32 %s1542_s21, 10 }
  0x51   : > { %s2381_s12 = scalar_select %p1700_p6, 1, 0 }
  0x52   : > { %s2382_s0 = sld [smem:[#allocation25_spill]]  ;;  %s226_s26 = scalar_lea.vmem [#allocation3], %s1176_s15 }
  0x53   : > { %s233_s27 = sshll.u32 %s226_s26, 4  ;;  %p1714_p11 = pnand %p1328_p8, %p40_p5  ;;  %s1712_s27 = int_to_ptr.vmem [resolvable:$true] %s233_s27 }
  0x54   : > { %s1718_s30 = scalar_lea.sflag [#allocation4], %s222_s13 }
  0x55   : > { %p1440_p10 = pneg %p1714_p11 }
  0x58   : > { %s1710_s23 = scalar_lea.hbm %s2382_s0, %s1281_s14  ;;  %s1443_s11 = scalar_lea.hbm %s2382_s0, 2048 }
  0x59   : > { %s1438_s6 = scalar_lea.hbm %s1710_s23, 1024  ;;  %p1444_p9 = scmp.lt.s32.totalorder %s1710_s23, %s2382_s0 }
  0x5a   : > { %p1439_p7 = scmp.ne.s32.totalorder %s1710_s23, %s1438_s6  ;;  %p1445_p3 = scmp.lt.s32.totalorder %s1443_s11, %s1438_s6 }
  0x5c   : > { %p1441_p12 = pnand %p1440_p10, %p1439_p7  ;;  %p1446_p13 = por %p1445_p3, %p1444_p9 }
  0x5e   : > { %p1442_p0 = pneg %p1441_p12 }
  0x60   : > { %p1447_p1 = pnand %p1446_p13, %p1442_p0 }
  0x62   : > { %1450 = shalt.err (!%p1447_p1)
}
  0x63   : > { %s1451_s13 = scalar_lea.vmem %s1712_s27, 1024  ;;  %s1548_s16 = smov [#allocation3]  }
  0x64   : > { %p1452_p2 = scmp.ne.s32.totalorder %s1712_s27, %s1451_s13  ;;  %s1456_s17 = sshll.u32 %s1548_s16, 4  ;;  %s1457_s17 = int_to_ptr.vmem [resolvable:$false] %s1456_s17 }
  0x65   : > { %s1458_s26 = scalar_lea.vmem %s1457_s17, 2048  ;;  %p1459_p8 = scmp.lt.s32.totalorder %s1712_s27, %s1457_s17 }
  0x66   : > { %p1454_p5 = pnand %p1452_p2, %p1440_p10  ;;  %p1460_p7 = scmp.lt.s32.totalorder %s1458_s26, %s1451_s13 }
  0x68   : > { %p1455_p4 = pneg %p1454_p5  ;;  %p1461_p12 = por %p1460_p7, %p1459_p8 }
  0x6a   : > { %p1462_p6 = pnand %p1461_p12, %p1455_p4 }
  0x6c   : > { %1465 = shalt.err (!%p1462_p6)
}
  0x6d   : > { %s1549_s6 = smov 128   ;;  %s1550_s7 = smov 8  }
  0x6e   : > { %1319 = dma.hbm_to_vmem [thread:$0]  (!%p1714_p11), %s1710_s23, 1024, %s1712_s27, %s1718_s30, %s1549_s6, %s1549_s6, %s1550_s7  }
  0x6f   : > { %p2384_p10 = scmp.ne.s32.totalorder %s2373_s29, 0 }
  0x70   : > { %s1742_s10 = sand.u32 (!%p2384_p10), 1, %s1534_s19   ;;  %p2385_p6 = scmp.ne.s32.totalorder (!%p2384_p10), %s2369_s24, 0 }
  0x71   : > { %245 = sbr.rel (%p2384_p10) target bundleno = 502 (0x1f6), region = 40  ;;  %s1180_s11 = sshll.u32 (!%p2384_p10), %s1742_s10, 6 }
  0x72   : > { %s248_s15 = scalar_lea.sflag (!%p2384_p10), [#allocation4], %s1742_s10  ;;  %s1746_s14 = scalar_lea.vmem (!%p2384_p10), [#allocation3], %s1180_s11 }
  0x76   : > { %1509 = dma.done.wait (%p2385_p6), %s248_s15, 1024  }
  0x77   : > { %1511 = vsyncadd (%p2385_p6), %s248_s15, 4294966272  ;;  %p2386_p11 = scmp.eq.s32.totalorder %s1609_s22, 0 }
  0x79   : > { %1513 = dma.done.wait (%p2386_p11), [#allocation6], 16   ;;  %p2387_p0 = pmov %p2386_p11 }
  0x7b   : > { %1515 = vsyncadd (%p2387_p0), [#allocation6], 4294967280  ;;  %p2388_p9 = pmov %p2387_p0 }
  0x7c   : > { %p2389_p3 = pmov %p2387_p0 }
  0x7d   : > { %1517 = dma.done.wait (%p2388_p9), [#allocation9], 32  }
  0x7e   : > { %1519 = vsyncadd (%p2389_p3), [#allocation9], 4294967264  ;;  %p2390_p13 = pmov %p2387_p0 }
  0x7f   : > { %p2391_p1 = pmov %p2387_p0 }
  0x80   : > { %1521 = dma.done.wait (%p2390_p13), [#allocation12], 16  }
  0x81   : > { %1523 = vsyncadd (%p2391_p1), [#allocation12], 4294967280 }
  0x82   : > { %272 = sfence }
  0x83   : > { %v309_v0 = vld [vmem:[%s1746_s14] sm:$0xff]  ;;  %v311_v1 = vld [vmem:[%s1746_s14 + $0x10] sm:$0xff]  ;;  %vm295_vm0 = vcmask 146432   ;;  %s1551_s24 = smov 1   ;;  %vm298_vm1 = vcmask 140288   ;;  %v310_v2 = vld [vmem:[%s1746_s14 + $0x8] sm:$0xff] }
  0x84   : > { %325 = vrot.lane.b32.xlu0 %v309_v0, %s1551_s24  ;;  %329 = vrot.lane.b32.xlu1 %v311_v1, %s1551_s24  ;;  %v312_v3 = vld [vmem:[%s1746_s14 + $0x18] sm:$0xff]  ;;  %v1552_v4 = vmov 0.0   ;;  %v313_v5 = vld [vmem:[%s1746_s14 + $0x20] sm:$0xff]  ;;  %vm349_vm2 = vcmask 138248   ;;  %s1186_s29 = sld [smem:[#allocation7 + $0x1]]  ;;  %s1553_s30 = smov 127  }
  0x85   : > { %296 = vst.msk [vmem:[#allocation2] sm:$0xff] %vm295_vm0, %v1552_v4  ;;  %297 = vst.msk [vmem:[#allocation2 + $0x8] sm:$0xff] %vm295_vm0, %v1552_v4  ;;  %v314_v6 = vld [vmem:[%s1746_s14 + $0x28] sm:$0xff]  ;;  %v315_v7 = vld [vmem:[%s1746_s14 + $0x30] sm:$0xff]  ;;  %s1774_s23 = sld [smem:[#allocation7 + $0x2]]  ;;  %s1554_s16 = smov 126  }
  0x86   : > { %300 = vst.msk [vmem:[#allocation2 + $0x18] sm:$0xff] %vm295_vm0, %v1552_v4  ;;  %301 = vst.msk [vmem:[#allocation2 + $0x20] sm:$0xff] %vm295_vm0, %v1552_v4  ;;  %v316_v8 = vld [vmem:[%s1746_s14 + $0x38] sm:$0xff]  ;;  %s1778_s27 = sld [smem:[#allocation7 + $0x4]]  ;;  %vm835_vm3 = vcmask 130048   ;;  %p2392_p5 = scmp.ne.s32.totalorder %s2381_s12, 0 }
  0x87   : > { %303 = vst.msk [vmem:[#allocation2 + $0x30] sm:$0xff] %vm295_vm0, %v1552_v4  ;;  %304 = vst.msk [vmem:[#allocation2 + $0x38] sm:$0xff] %vm295_vm0, %v1552_v4  ;;  %s1782_s28 = sld [smem:[#allocation7 + $0xa]] }
  0x88   : > { %306 = vst.msk [vmem:[#allocation2 + $0x48] sm:$0xff] %vm295_vm0, %v1552_v4  ;;  %307 = vst.msk [vmem:[#allocation2 + $0x50] sm:$0xff] %vm295_vm0, %v1552_v4  ;;  %327 = vrot.lane.b32.xlu0 %v310_v2, %s1551_s24  ;;  %331 = vrot.lane.b32.xlu1 %v312_v3, %s1551_s24  ;;  %s1197_s13 = sld [smem:[#allocation7 + $0xb]] }
  0x89   : > { %299 = vst.msk [vmem:[#allocation2 + $0x10] sm:$0x3] %vm298_vm1, %v1552_v4  ;;  %302 = vst.msk [vmem:[#allocation2 + $0x28] sm:$0x3] %vm298_vm1, %v1552_v4  ;;  %s1206_s17 = sld [smem:[#allocation7 + $0x13]] }
  0x8a   : > { %305 = vst.msk [vmem:[#allocation2 + $0x40] sm:$0x3] %vm298_vm1, %v1552_v4  ;;  %308 = vst.msk [vmem:[#allocation2 + $0x58] sm:$0x3] %vm298_vm1, %v1552_v4  ;;  %v369_v13 = vstv %s1186_s29  ;;  %s1207_s26 = sld [smem:[#allocation7 + $0x14]] }
  0x8b   : > { %v383_v18 = vstv %s1774_s23  ;;  %s1216_s6 = sld [smem:[#allocation7 + $0x1c]] }
  0x8c   : > { %333 = vrot.lane.b32.xlu0 %v313_v5, %s1551_s24  ;;  %335 = vrot.lane.b32.xlu1 %v314_v6, %s1551_s24  ;;  %v405_v25 = vstv %s1778_s27  ;;  %s1190_s7 = sld [smem:[#allocation7 + $0x5]] }
  0x8d   : > { %v482_v27 = vstv %s1782_s28  ;;  %s1199_s11 = sld [smem:[#allocation7 + $0xd]] }
  0x8e   : > { %v496_v34 = vstv %s1197_s13  ;;  %s1217_s15 = sld [smem:[#allocation7 + $0x1d]] }
  0x8f   : > { %v595_v36 = vstv %s1206_s17  ;;  %s1200_s14 = sld [smem:[#allocation7 + $0xe]] }
  0x90   : > { %337 = vrot.lane.b32.xlu0 %v315_v7, %s1551_s24  ;;  %339 = vrot.lane.b32.xlu1 %v316_v8, %s1551_s24  ;;  %v609_v41 = vstv %s1207_s26  ;;  %s1209_s24 = sld [smem:[#allocation7 + $0x16]] }
  0x91   : > { %v708_v46 = vstv %s1216_s6  ;;  %s1192_s29 = sld [smem:[#allocation7 + $0x7]] }
  0x92   : > { %v419_v50 = vstv %s1190_s7  ;;  %s1210_s23 = sld [smem:[#allocation7 + $0x17]] }
  0x93   : > { %v518_v54 = vstv %s1199_s11  ;;  %s1219_s27 = sld [smem:[#allocation7 + $0x1f]] }
  0x94   : > { %v722_v58 = vstv %s1217_s15  ;;  %s1193_s28 = sld [smem:[#allocation7 + $0x8]] }
  0x95   : > { %v532_v61 = vstv %s1200_s14  ;;  %s1202_s13 = sld [smem:[#allocation7 + $0x10]] }
  0x96   : > { %v631_v1 = vstv %s1209_s24  ;;  %s1220_s17 = sld [smem:[#allocation7 + $0x20]] }
  0x97   : > { %v441_v6 = vstv %s1192_s29  ;;  %s1203_s26 = sld [smem:[#allocation7 + $0x11]] }
  0x98   : > { %s1212_s6 = sld [smem:[#allocation7 + $0x19]] }
  0x99   : > { %s1213_s7 = sld [smem:[#allocation7 + $0x1a]] }
  0x9a   : > { %s1222_s11 = sld [smem:[#allocation7 + $0x22]] }
  0x9b   : > { %s1223_s15 = sld [smem:[#allocation7 + $0x23]] }
  0x9c   : > { %s360_s14 = sld [smem:[#allocation7]] }
  0x9d   : > { %s358_s24 = sld [smem:[#allocation8]] }
  0x9e   : > { %s1188_s29 = sld [smem:[#allocation7 + $0x3]] }
  0x9f   : > { %s2031_s0 = sld [smem:[#allocation10 + $0x18]] }
  0xa0   : > { %s2033_s1 = sld [smem:[#allocation11 + $0x7]] }
  0xa1   : > { %s2035_s2 = sld [smem:[#allocation10 + $0x1c]] }
  0xa2   : > { %s2038_s3 = sld [smem:[#allocation10 + $0x1]] }
  0xa3   : > { %s2041_s4 = sld [smem:[#allocation10 + $0x5]] }
  0xa4   : > { %s2047_s8 = sld [smem:[#allocation10 + $0xd]] }
  0xa5   : > { %s2050_s20 = sld [smem:[#allocation10 + $0x11]] }
  0xa6   : > { %s2054_s19 = sld [smem:[#allocation10 + $0x15]] }
  0xa7   : > { %s2058_s9 = sld [smem:[#allocation10 + $0x19]] }
  0xa8   : > { %s2060_s21 = sld [smem:[#allocation10 + $0x1d]] }
  0xa9   : > { %s2075_s25 = sld [smem:[#allocation10 + $0x6]] }
  0xf6   : > { %v326_v9 = vpop.permute.xlu0 %325  ;;  %v330_v10 = vpop.permute.xlu1 %329 }
  0xf7   : > { %350 = vst.msk [vmem:[#allocation2 + $0x1] sm:$0xff] %vm349_vm2, %v326_v9  ;;  %352 = vst.msk [vmem:[#allocation2 + $0x19] sm:$0xff] %vm349_vm2, %v330_v10  ;;  %v645_v10 = vstv %s1210_s23  ;;  %s1195_s23 = sld [smem:[#allocation7 + $0x9]] }
  0xfa   : > { %v328_v11 = vpop.permute.xlu0 %327  ;;  %v332_v12 = vpop.permute.xlu1 %331 }
  0xfb   : > { %351 = vst.msk [vmem:[#allocation2 + $0x9] sm:$0xff] %vm349_vm2, %v328_v11  ;;  %353 = vst.msk [vmem:[#allocation2 + $0x21] sm:$0xff] %vm349_vm2, %v332_v12 }
  0xfe   : > { %v1780_v14 = vld [vmem:[#allocation2] sm:$0xff]  ;;  %v334_v15 = vpop.permute.xlu0 %333  ;;  %v336_v16 = vpop.permute.xlu1 %335  ;;  %v1800_v26 = vld [vmem:[#allocation2 + $0x18] sm:$0xff] }
  0xff   : > { %v370_v17 = vmul.f32 %v369_v13, %v1780_v14  ;;  %354 = vst.msk [vmem:[#allocation2 + $0x31] sm:$0xff] %vm349_vm2, %v334_v15  ;;  %355 = vst.msk [vmem:[#allocation2 + $0x39] sm:$0xff] %vm349_vm2, %v336_v16  ;;  %v384_v23 = vmul.f32 %v383_v18, %v1780_v14  ;;  %v1795_v24 = vld [vmem:[#allocation2 + $0x1] sm:$0xff]  ;;  %v483_v31 = vmul.f32 %v482_v27, %v1800_v26  ;;  %v1841_v53 = vld [vmem:[#allocation2 + $0x19] sm:$0xff]  ;;  %v744_v15 = vstv %s1219_s27  ;;  %s1940_s27 = sld [smem:[#allocation7 + $0xc]] }
 0x100   : > { %v406_v29 = vmul.f32 %v405_v25, %v1795_v24  ;;  %v497_v38 = vmul.f32 %v496_v34, %v1800_v26  ;;  %v420_v52 = vmul.f32 %v419_v50, %v1795_v24  ;;  %v519_v56 = vmul.f32 %v518_v54, %v1841_v53 }
 0x101   : > { %374 = vrot.lane.b32.xlu0 %v370_v17, %s1553_s30  ;;  %v533_v63 = vmul.f32 %v532_v61, %v1841_v53 }
 0x102   : > { %v1789_v19 = vld [vmem:[#allocation2 + $0x8] sm:$0xff]  ;;  %v338_v20 = vpop.permute.xlu0 %337  ;;  %v340_v21 = vpop.permute.xlu1 %339  ;;  %v1811_v33 = vld [vmem:[#allocation2 + $0x20] sm:$0xff] }
 0x103   : > { %v371_v22 = vmul.f32 %v369_v13, %v1789_v19  ;;  %356 = vst.msk [vmem:[#allocation2 + $0x49] sm:$0xff] %vm349_vm2, %v338_v20  ;;  %357 = vst.msk [vmem:[#allocation2 + $0x51] sm:$0xff] %vm349_vm2, %v340_v21  ;;  %v385_v28 = vmul.f32 %v383_v18, %v1789_v19  ;;  %v1805_v30 = vld [vmem:[#allocation2 + $0x9] sm:$0xff]  ;;  %v484_v37 = vmul.f32 %v482_v27, %v1811_v33  ;;  %v1847_v57 = vld [vmem:[#allocation2 + $0x21] sm:$0xff]  ;;  %v455_v20 = vstv %s1193_s28  ;;  %s1945_s28 = sld [smem:[#allocation8 + $0x2]] }
 0x104   : > { %v407_v32 = vmul.f32 %v405_v25, %v1805_v30  ;;  %v498_v42 = vmul.f32 %v496_v34, %v1811_v33  ;;  %v421_v55 = vmul.f32 %v419_v50, %v1805_v30  ;;  %v520_v59 = vmul.f32 %v518_v54, %v1847_v57  ;;  %v1865_v5 = vld [vmem:[#allocation2 + $0x2] sm:$0xff]  ;;  %v1871_v9 = vld [vmem:[#allocation2 + $0xa] sm:$0xff] }
 0x105   : > { %376 = vrot.lane.b32.xlu1 %v371_v22, %s1553_s30  ;;  %388 = vrot.lane.b32.xlu0 %v384_v23, %s1554_s16  ;;  %v534_v2 = vmul.f32 %v532_v61, %v1847_v57  ;;  %v442_v8 = vmul.f32 %v441_v6, %v1865_v5  ;;  %v443_v11 = vmul.f32 %v441_v6, %v1871_v9  ;;  %v1889_v23 = vld [vmem:[#allocation2 + $0x1a] sm:$0xff]  ;;  %v554_v25 = vstv %s1202_s13  ;;  %s1950_s13 = sld [smem:[#allocation7 + $0x15]] }
 0x106   : > { %v1815_v35 = vld [vmem:[#allocation2 + $0x30] sm:$0xff]  ;;  %v1822_v40 = vld [vmem:[#allocation2 + $0x38] sm:$0xff]  ;;  %v456_v22 = vmul.f32 %v455_v20, %v1865_v5  ;;  %v457_v27 = vmul.f32 %v455_v20, %v1871_v9  ;;  %v363_v61 = vstv %s360_s14  ;;  %s1989_s14 = sld [smem:[#allocation7 + $0x21]] }
 0x107   : > { %v596_v39 = vmul.f32 %v595_v36, %v1815_v35  ;;  %v597_v43 = vmul.f32 %v595_v36, %v1822_v40  ;;  %v610_v44 = vmul.f32 %v609_v41, %v1815_v35  ;;  %v611_v49 = vmul.f32 %v609_v41, %v1822_v40  ;;  %v1857_v0 = vld [vmem:[#allocation2 + $0x31] sm:$0xff]  ;;  %v1863_v4 = vld [vmem:[#allocation2 + $0x39] sm:$0xff] }
 0x108   : > { %v632_v3 = vmul.f32 %v631_v1, %v1857_v0  ;;  %v633_v7 = vmul.f32 %v631_v1, %v1863_v4  ;;  %v646_v12 = vmul.f32 %v645_v10, %v1857_v0  ;;  %v647_v16 = vmul.f32 %v645_v10, %v1863_v4 }
 0x109   : > { %390 = vrot.lane.b32.xlu1 %v385_v28, %s1554_s16  ;;  %410 = vrot.lane.b32.xlu0 %v406_v29, %s1553_s30  ;;  %v555_v28 = vmul.f32 %v554_v25, %v1889_v23  ;;  %v1895_v29 = vld [vmem:[#allocation2 + $0x22] sm:$0xff]  ;;  %v568_v36 = vstv %s1203_s26  ;;  %v667_v41 = vstv %s1212_s6  ;;  %s1960_s26 = sld [smem:[#allocation7 + $0x6]] }
 0x10a   : > { %v1829_v45 = vld [vmem:[#allocation2 + $0x48] sm:$0xff]  ;;  %v1834_v48 = vld [vmem:[#allocation2 + $0x50] sm:$0xff]  ;;  %s1963_s6 = sld [smem:[#allocation8 + $0x3]] }
 0x10b   : > { %v709_v47 = vmul.f32 %v708_v46, %v1829_v45  ;;  %v710_v51 = vmul.f32 %v708_v46, %v1834_v48  ;;  %v723_v60 = vmul.f32 %v722_v58, %v1829_v45  ;;  %v724_v62 = vmul.f32 %v722_v58, %v1834_v48  ;;  %v1877_v13 = vld [vmem:[#allocation2 + $0x49] sm:$0xff]  ;;  %v1883_v18 = vld [vmem:[#allocation2 + $0x51] sm:$0xff] }
 0x10c   : > { %v745_v17 = vmul.f32 %v744_v15, %v1877_v13  ;;  %v746_v21 = vmul.f32 %v744_v15, %v1883_v18  ;;  %v681_v46 = vstv %s1213_s7  ;;  %v1917_v50 = vld [vmem:[#allocation2 + $0x4a] sm:$0xff]  ;;  %s1970_s7 = sld [smem:[#allocation7 + $0x1e]] }
 0x10d   : > { %412 = vrot.lane.b32.xlu1 %v407_v32, %s1553_s30  ;;  %487 = vrot.lane.b32.xlu0 %v483_v31, %s1553_s30  ;;  %v758_v31 = vstv %s1220_s17  ;;  %v556_v32 = vmul.f32 %v554_v25, %v1895_v29  ;;  %s1956_s17 = sld [smem:[#allocation7 + $0x1b]] }
 0x10e   : > { %v759_v34 = vmul.f32 %v758_v31, %v1877_v13 }
 0x111   : > { %489 = vrot.lane.b32.xlu1 %v484_v37, %s1553_s30  ;;  %501 = vrot.lane.b32.xlu0 %v497_v38, %s1554_s16  ;;  %v760_v37 = vmul.f32 %v758_v31, %v1883_v18  ;;  %v569_v38 = vmul.f32 %v568_v36, %v1889_v23 }
 0x115   : > { %503 = vrot.lane.b32.xlu1 %v498_v42, %s1554_s16  ;;  %600 = vrot.lane.b32.xlu0 %v596_v39, %s1553_s30  ;;  %v1905_v39 = vld [vmem:[#allocation2 + $0x32] sm:$0xff]  ;;  %v570_v42 = vmul.f32 %v568_v36, %v1895_v29 }
 0x119   : > { %602 = vrot.lane.b32.xlu1 %v597_v43, %s1553_s30  ;;  %614 = vrot.lane.b32.xlu0 %v610_v44, %s1554_s16  ;;  %v668_v43 = vmul.f32 %v667_v41, %v1905_v39  ;;  %v1911_v44 = vld [vmem:[#allocation2 + $0x3a] sm:$0xff] }
 0x11d   : > { %616 = vrot.lane.b32.xlu1 %v611_v49, %s1554_s16  ;;  %713 = vrot.lane.b32.xlu0 %v709_v47, %s1553_s30  ;;  %v669_v47 = vmul.f32 %v667_v41, %v1911_v44  ;;  %v682_v49 = vmul.f32 %v681_v46, %v1905_v39  ;;  %v512_v41 = vstv %s1940_s27  ;;  %s2008_s27 = sld [smem:[#allocation10 + $0x8]] }
 0x121   : > { %715 = vrot.lane.b32.xlu1 %v710_v51, %s1553_s30  ;;  %424 = vrot.lane.b32.xlu0 %v420_v52, %s1554_s16  ;;  %v780_v51 = vstv %s1222_s11  ;;  %v683_v52 = vmul.f32 %v681_v46, %v1911_v44  ;;  %s1977_s11 = sld [smem:[#allocation7 + $0xf]] }
 0x122   : > { %v781_v54 = vmul.f32 %v780_v51, %v1917_v50 }
 0x125   : > { %426 = vrot.lane.b32.xlu1 %v421_v55, %s1554_s16  ;;  %523 = vrot.lane.b32.xlu0 %v519_v56, %s1553_s30  ;;  %v1923_v55 = vld [vmem:[#allocation2 + $0x52] sm:$0xff]  ;;  %v794_v56 = vstv %s1223_s15  ;;  %s1986_s15 = sld [smem:[#allocation7 + $0x18]] }
 0x126   : > { %v782_v58 = vmul.f32 %v780_v51, %v1923_v55  ;;  %v584_v51 = vstv %s1945_s28  ;;  %s2012_s28 = sld [smem:[#allocation11 + $0x3]] }
 0x129   : > { %525 = vrot.lane.b32.xlu1 %v520_v59, %s1553_s30  ;;  %727 = vrot.lane.b32.xlu0 %v723_v60, %s1554_s16  ;;  %v795_v59 = vmul.f32 %v794_v56, %v1917_v50  ;;  %v796_v60 = vmul.f32 %v794_v56, %v1923_v55 }
 0x12d   : > { %729 = vrot.lane.b32.xlu1 %v724_v62, %s1554_s16  ;;  %537 = vrot.lane.b32.xlu0 %v533_v63, %s1554_s16  ;;  %v364_v62 = vmul.f32 %v363_v61, %v1780_v14  ;;  %v359_v63 = vstv %s358_s24  ;;  %v476_v14 = vstv %s1195_s23  ;;  %s1991_s24 = sld [smem:[#allocation11]] }
 0x12e   : > { %s1998_s23 = sld [smem:[#allocation11 + $0x1]] }
 0x12f   : > { %v366_v1 = vadd.f32 %v364_v62, %v359_v63  ;;  %v625_v62 = vstv %s1950_s13  ;;  %s2014_s13 = sld [smem:[#allocation10 + $0xc]] }
 0x131   : > { %539 = vrot.lane.b32.xlu1 %v534_v2, %s1554_s16  ;;  %636 = vrot.lane.b32.xlu0 %v632_v3, %s1553_s30  ;;  %v365_v2 = vmul.f32 %v363_v61, %v1789_v19  ;;  %v514_v61 = vmul.f32 %v512_v41, %v1847_v57 }
 0x135   : > { %638 = vrot.lane.b32.xlu1 %v633_v7, %s1553_s30  ;;  %446 = vrot.lane.b32.xlu0 %v442_v8, %s1553_s30  ;;  %v399_v7 = vstv %s1188_s29  ;;  %v367_v8 = vadd.f32 %v365_v2, %v359_v63  ;;  %s1996_s29 = sld [smem:[#allocation10]] }
 0x136   : > { %v401_v25 = vmul.f32 %v399_v7, %v1805_v30 }
 0x139   : > { %448 = vrot.lane.b32.xlu1 %v443_v11, %s1553_s30  ;;  %650 = vrot.lane.b32.xlu0 %v646_v12, %s1554_s16 }
 0x13d   : > { %652 = vrot.lane.b32.xlu1 %v647_v16, %s1554_s16  ;;  %749 = vrot.lane.b32.xlu0 %v745_v17, %s1553_s30  ;;  %v400_v16 = vmul.f32 %v399_v7, %v1795_v24 }
 0x141   : > { %751 = vrot.lane.b32.xlu1 %v746_v21, %s1553_s30  ;;  %460 = vrot.lane.b32.xlu0 %v456_v22, %s1554_s16 }
 0x145   : > { %462 = vrot.lane.b32.xlu1 %v457_v27, %s1554_s16  ;;  %559 = vrot.lane.b32.xlu0 %v555_v28, %s1553_s30  ;;  %v477_v27 = vmul.f32 %v476_v14, %v1800_v26 }
 0x149   : > { %561 = vrot.lane.b32.xlu1 %v556_v32, %s1553_s30  ;;  %763 = vrot.lane.b32.xlu0 %v759_v34, %s1554_s16 }
 0x14d   : > { %765 = vrot.lane.b32.xlu1 %v760_v37, %s1554_s16  ;;  %573 = vrot.lane.b32.xlu0 %v569_v38, %s1554_s16  ;;  %v478_v37 = vmul.f32 %v476_v14, %v1811_v33 }
 0x151   : > { %575 = vrot.lane.b32.xlu1 %v570_v42, %s1554_s16  ;;  %672 = vrot.lane.b32.xlu0 %v668_v43, %s1553_s30 }
 0x155   : > { %674 = vrot.lane.b32.xlu1 %v669_v47, %s1553_s30  ;;  %686 = vrot.lane.b32.xlu0 %v682_v49, %s1554_s16  ;;  %v513_v49 = vmul.f32 %v512_v41, %v1841_v53 }
 0x159   : > { %688 = vrot.lane.b32.xlu1 %v683_v52, %s1554_s16  ;;  %785 = vrot.lane.b32.xlu0 %v781_v54, %s1553_s30 }
 0x15d   : > { %787 = vrot.lane.b32.xlu1 %v782_v58, %s1553_s30  ;;  %799 = vrot.lane.b32.xlu0 %v795_v59, %s1554_s16  ;;  %s1935_s30 = sld [smem:[#allocation8 + $0x1]] }
 0x161   : > { %801 = vrot.lane.b32.xlu1 %v796_v60, %s1554_s16  ;;  %s1938_s16 = sld [smem:[#allocation7 + $0x12]] }
 0x163   : > { %v471_v28 = vstv %s1935_s30  ;;  %s2001_s30 = sld [smem:[#allocation10 + $0x4]] }
 0x164   : > { %v479_v36 = vadd.f32 %v477_v27, %v471_v28  ;;  %v480_v26 = vadd.f32 %v478_v37, %v471_v28 }
 0x167   : > { %v589_v38 = vstv %s1938_s16  ;;  %s2004_s16 = sld [smem:[#allocation11 + $0x2]] }
 0x168   : > { %v590_v47 = vmul.f32 %v589_v38, %v1815_v35  ;;  %v591_v60 = vmul.f32 %v589_v38, %v1822_v40 }
 0x16a   : > { %v592_v59 = vadd.f32 %v590_v47, %v584_v51  ;;  %v593_v2 = vadd.f32 %v591_v60, %v584_v51 }
 0x173   : > { %v375_v3 = vpop.permute.xlu0 %374 }
 0x174   : > { %v380_v6 = vadd.f32 %v375_v3, %v366_v1 }
 0x177   : > { %v377_v10 = vpop.permute.xlu1 %376  ;;  %v389_v11 = vpop.permute.xlu0 %388 }
 0x178   : > { %v381_v12 = vadd.f32 %v377_v10, %v367_v8  ;;  %v394_v15 = vadd.f32 %v389_v11, %v380_v6  ;;  %v626_v6 = vmul.f32 %v625_v62, %v1857_v0  ;;  %v627_v11 = vmul.f32 %v625_v62, %v1863_v4 }
 0x17a   : > { %v402_v19 = vadd.f32 %v400_v16, %v394_v15  ;;  %v435_v15 = vstv %s1960_s26  ;;  %s2019_s26 = sld [smem:[#allocation10 + $0x10]] }
 0x17b   : > { %v391_v17 = vpop.permute.xlu1 %390  ;;  %v411_v20 = vpop.permute.xlu0 %410 }
 0x17c   : > { %v395_v21 = vadd.f32 %v391_v17, %v381_v12  ;;  %v416_v22 = vadd.f32 %v411_v20, %v402_v19  ;;  %v702_v12 = vstv %s1956_s17  ;;  %v436_v20 = vmul.f32 %v435_v15, %v1865_v5  ;;  %s2017_s17 = sld [smem:[#allocation11 + $0x4]] }
 0x17d   : > { %v703_v19 = vmul.f32 %v702_v12, %v1829_v45 }
 0x17e   : > { %v403_v24 = vadd.f32 %v401_v25, %v395_v21  ;;  %v697_v21 = vstv %s1963_s6  ;;  %s2023_s6 = sld [smem:[#allocation11 + $0x5]] }
 0x17f   : > { %v413_v31 = vpop.permute.xlu1 %412  ;;  %v488_v32 = vpop.permute.xlu0 %487  ;;  %v705_v28 = vadd.f32 %v703_v19, %v697_v21  ;;  %v841_v19 = vstv %s2001_s30  ;;  %s2157_s30 = sld [smem:[#allocation10 + $0x1e]] }
 0x180   : > { %v417_v34 = vadd.f32 %v413_v31, %v403_v24  ;;  %v493_v42 = vadd.f32 %v488_v32, %v479_v36  ;;  %v704_v24 = vmul.f32 %v702_v12, %v1834_v48  ;;  %v437_v32 = vmul.f32 %v435_v15, %v1871_v9 }
 0x181   : > { %v738_v36 = vstv %s1970_s7  ;;  %v548_v48 = vstv %s1977_s11  ;;  %s2025_s7 = sld [smem:[#allocation10 + $0x14]]  ;;  %v810_v15 = vstv %s1991_s24 }
 0x182   : > { %v706_v38 = vadd.f32 %v704_v24, %v697_v21  ;;  %s2027_s11 = sld [smem:[#allocation11 + $0x6]]  ;;  %v899_v21 = vstv %s2014_s13 }
 0x183   : > { %v490_v43 = vpop.permute.xlu1 %489  ;;  %v502_v30 = vpop.permute.xlu0 %501  ;;  %s2137_s24 = sld [smem:[#allocation10 + $0x16]] }
 0x184   : > { %v507_v46 = vadd.f32 %v502_v30, %v493_v42  ;;  %v494_v52 = vadd.f32 %v490_v43, %v480_v26  ;;  %v739_v42 = vmul.f32 %v738_v36, %v1877_v13  ;;  %v549_v13 = vmul.f32 %v548_v48, %v1889_v23 }
 0x186   : > { %v515_v54 = vadd.f32 %v513_v49, %v507_v46  ;;  %v740_v49 = vmul.f32 %v738_v36, %v1883_v18  ;;  %v550_v18 = vmul.f32 %v548_v48, %v1895_v29  ;;  %v986_v36 = vstv %s2031_s0  ;;  %s2117_s0 = sld [smem:[#allocation10 + $0xa]] }
 0x187   : > { %v504_v56 = vpop.permute.xlu1 %503  ;;  %v601_v58 = vpop.permute.xlu0 %600 }
 0x188   : > { %v508_v33 = vadd.f32 %v504_v56, %v494_v52  ;;  %v606_v35 = vadd.f32 %v601_v58, %v592_v59 }
 0x18a   : > { %v516_v53 = vadd.f32 %v514_v61, %v508_v33  ;;  %v661_v61 = vstv %s1986_s15  ;;  %s2045_s15 = sld [smem:[#allocation10 + $0x9]] }
 0x18b   : > { %v603_v63 = vpop.permute.xlu1 %602  ;;  %v615_v1 = vpop.permute.xlu0 %614 }
 0x18c   : > { %v620_v3 = vadd.f32 %v615_v1, %v606_v35  ;;  %v607_v40 = vadd.f32 %v603_v63, %v593_v2  ;;  %v662_v63 = vmul.f32 %v661_v61, %v1905_v39  ;;  %v663_v39 = vmul.f32 %v661_v61, %v1911_v44 }
 0x18d   : > { %v853_v61 = vstv %s2075_s25 }
 0x18e   : > { %v1965_v7 = vadd.f32 %v626_v6, %v620_v3 }
 0x18f   : > { %v617_v57 = vpop.permute.xlu1 %616  ;;  %v714_v8 = vpop.permute.xlu0 %713 }
 0x190   : > { %v621_v10 = vadd.f32 %v617_v57, %v607_v40  ;;  %v719_v37 = vadd.f32 %v714_v8, %v705_v28  ;;  %v876_v48 = vstv %s2045_s15 }
 0x192   : > { %v1972_v16 = vadd.f32 %v627_v11, %v621_v10 }
 0x193   : > { %v716_v14 = vpop.permute.xlu1 %715  ;;  %v425_v0 = vpop.permute.xlu0 %424 }
 0x194   : > { %v430_v17 = vadd.f32 %v425_v0, %v416_v22 }
 0x196   : > { %v1979_v25 = vadd.f32 %v436_v20, %v430_v17  ;;  %v868_v17 = vstv %s2004_s16  ;;  %v870_v20 = vstv %s2008_s27  ;;  %s2169_s16 = sld [smem:[#allocation10 + $0x7]] }
 0x197   : > { %v427_v4 = vpop.permute.xlu1 %426  ;;  %v524_v27 = vpop.permute.xlu0 %523  ;;  %s2171_s27 = sld [smem:[#allocation10 + $0xb]] }
 0x198   : > { %v431_v31 = vadd.f32 %v427_v4, %v417_v34  ;;  %v720_v34 = vadd.f32 %v716_v14, %v706_v38  ;;  %v529_v43 = vadd.f32 %v524_v27, %v515_v54  ;;  %v839_v14 = vstv %s1998_s23  ;;  %s2147_s23 = sld [smem:[#allocation10 + $0x1a]] }
 0x199   : > { %v928_v4 = vstv %s2019_s26  ;;  %v847_v38 = vstv %s2041_s4  ;;  %s2209_s4 = sld [smem:[#allocation10 + $0x17]]  ;;  %s1042_s26 = scalar_lea.sflag [#allocation5], %s1742_s10 }
 0x19a   : > { %v1984_v45 = vadd.f32 %v437_v32, %v431_v31  ;;  %v957_v31 = vstv %s2025_s7  ;;  %v984_v32 = vstv %s2027_s11  ;;  %s1555_s7 = smov [#allocation13]  }
 0x19b   : > { %v526_v22 = vpop.permute.xlu1 %525  ;;  %v728_v5 = vpop.permute.xlu0 %727  ;;  %s1470_s11 = sshll.u32 %s1555_s7, 4  ;;  %s1471_s11 = int_to_ptr.vmem [resolvable:$false] %s1470_s11 }
 0x19c   : > { %v733_v41 = vadd.f32 %v728_v5, %v719_v37  ;;  %v530_v51 = vadd.f32 %v526_v22, %v516_v53  ;;  %v1013_v37 = vstv %s2033_s1  ;;  %v1015_v22 = vstv %s2035_s2  ;;  %s2121_s2 = sld [smem:[#allocation10 + $0xe]]  ;;  %s1472_s15 = scalar_lea.vmem %s1471_s11, 4096 }
 0x19d   : > { %v818_v5 = vstv %s2038_s3  ;;  %s2167_s1 = sld [smem:[#allocation10 + $0x3]] }
 0x19e   : > { %v1994_v9 = vadd.f32 %v739_v42, %v733_v41  ;;  %s2199_s3 = sld [smem:[#allocation10 + $0x13]] }
 0x19f   : > { %v730_v30 = vpop.permute.xlu1 %729  ;;  %v538_v26 = vpop.permute.xlu0 %537 }
 0x1a0   : > { %v734_v46 = vadd.f32 %v730_v30, %v720_v34  ;;  %v543_v47 = vadd.f32 %v538_v26, %v529_v43  ;;  %v905_v34 = vstv %s2047_s8 }
 0x1a2   : > { %v2006_v52 = vadd.f32 %v740_v49, %v734_v46  ;;  %v2010_v54 = vadd.f32 %v549_v13, %v543_v47  ;;  %v934_v49 = vstv %s2050_s20  ;;  %s2220_s20 = sld [smem:[#allocation10 + $0x1f]] }
 0x1a3   : > { %v540_v56 = vpop.permute.xlu1 %539  ;;  %v637_v58 = vpop.permute.xlu0 %636 }
 0x1a4   : > { %v544_v33 = vadd.f32 %v540_v56, %v530_v51  ;;  %v642_v62 = vadd.f32 %v637_v58, %v1965_v7  ;;  %v774_v7 = vstv %s1989_s14  ;;  %s2066_s14 = sld [smem:[#allocation10 + $0x2]] }
 0x1a5   : > { %v775_v12 = vmul.f32 %v774_v7, %v1917_v50  ;;  %v2069_v0 = vmul.f32 %v774_v7, %v1923_v55  ;;  %v897_v50 = vstv %s2012_s28  ;;  %v955_v55 = vstv %s2023_s6  ;;  %s2189_s28 = sld [smem:[#allocation10 + $0xf]] }
 0x1a6   : > { %v2021_v23 = vadd.f32 %v550_v18, %v544_v33  ;;  %v1021_v33 = vstv %s2060_s21  ;;  %s1185_s21 = sshll.u32 %s1742_s10, 7 }
 0x1a7   : > { %v639_v59 = vpop.permute.xlu1 %638  ;;  %v447_v60 = vpop.permute.xlu0 %446  ;;  %s2255_s25 = scalar_lea.vmem [#allocation13], %s1185_s21 }
 0x1a8   : > { %v643_v1 = vadd.f32 %v639_v59, %v1972_v16  ;;  %v452_v57 = vadd.f32 %v447_v60, %v1979_v25  ;;  %v812_v16 = vstv %s1996_s29  ;;  %v926_v25 = vstv %s2017_s17  ;;  %s2131_s29 = sld [smem:[#allocation10 + $0x12]]  ;;  %s1055_s8 = sshll.u32 %s2255_s25, 4  ;;  %s2286_s8 = int_to_ptr.vmem [resolvable:$true] %s1055_s8 }
 0x1a9   : > { %s1466_s6 = scalar_lea.vmem %s2286_s8, 2048  ;;  %p1473_p7 = scmp.lt.s32.totalorder %s2286_s8, %s1471_s11 }
 0x1aa   : > { %v824_v18 = vstv %s2066_s14  ;;  %p1467_p2 = scmp.ne.s32.totalorder %s2286_s8, %s1466_s6  ;;  %p1474_p12 = scmp.lt.s32.totalorder %s1472_s15, %s1466_s6 }
 0x1ab   : > { %v449_v29 = vpop.permute.xlu1 %448  ;;  %v651_v35 = vpop.permute.xlu0 %650 }
 0x1ac   : > { %v656_v53 = vadd.f32 %v651_v35, %v642_v62  ;;  %v453_v41 = vadd.f32 %v449_v29, %v1984_v45  ;;  %v963_v45 = vstv %s2054_s19  ;;  %s2214_s19 = sld [smem:[#allocation10 + $0x1b]]  ;;  %p1468_p4 = pnand %p1467_p2, %p2392_p5 }
 0x1ad   : > { %p1475_p10 = por %p1474_p12, %p1473_p7 }
 0x1ae   : > { %v2043_v2 = vadd.f32 %v662_v63, %v656_v53  ;;  %p1469_p8 = pneg %p1468_p4 }
 0x1af   : > { %v653_v3 = vpop.permute.xlu1 %652  ;;  %v750_v6 = vpop.permute.xlu0 %749 }
 0x1b0   : > { %v657_v40 = vadd.f32 %v653_v3, %v643_v1  ;;  %v755_v42 = vadd.f32 %v750_v6, %v1994_v9  ;;  %v992_v9 = vstv %s2058_s9  ;;  %s1282_s9 = sshll.u32 %s1609_s22, 11  ;;  %p1476_p6 = pnand %p1475_p10, %p1469_p8 }
 0x1b1   : > { %s2284_s17 = scalar_lea.hbm %s2350_s5, %s1282_s9 }
 0x1b2   : > { %v2056_v8 = vadd.f32 %v663_v39, %v657_v40 }
 0x1b3   : > { %v752_v10 = vpop.permute.xlu1 %751  ;;  %v461_v11 = vpop.permute.xlu0 %460 }
 0x1b4   : > { %v466_v44 = vadd.f32 %v461_v11, %v452_v57  ;;  %v756_v59 = vadd.f32 %v752_v10, %v2006_v52 }
 0x1b6   : > { %v468_v27 = vmax.f32 %v466_v44, 0.0 }
 0x1b7   : > { %v463_v28 = vpop.permute.xlu1 %462  ;;  %v560_v24 = vpop.permute.xlu0 %559 }
 0x1b8   : > { %v813_v43 = vmul.f32 %v812_v16, %v468_v27  ;;  %v842_v30 = vmul.f32 %v841_v19, %v468_v27  ;;  %v871_v26 = vmul.f32 %v870_v20, %v468_v27  ;;  %v900_v13 = vmul.f32 %v899_v21, %v468_v27 }
 0x1b9   : > { %v929_v51 = vmul.f32 %v928_v4, %v468_v27  ;;  %v467_v56 = vadd.f32 %v463_v28, %v453_v41  ;;  %v958_v35 = vmul.f32 %v957_v31, %v468_v27  ;;  %v987_v53 = vmul.f32 %v986_v36, %v468_v27 }
 0x1ba   : > { %v815_v29 = vadd.f32 %v813_v43, %v810_v15  ;;  %v1016_v63 = vmul.f32 %v1015_v22, %v468_v27  ;;  %v844_v6 = vadd.f32 %v842_v30, %v839_v14  ;;  %v873_v40 = vadd.f32 %v871_v26, %v868_v17 }
 0x1bb   : > { %v562_v46 = vpop.permute.xlu1 %561  ;;  %v764_v47 = vpop.permute.xlu0 %763  ;;  %v469_v60 = vmax.f32 %v467_v56, 0.0  ;;  %v902_v39 = vadd.f32 %v900_v13, %v897_v50  ;;  %v931_v52 = vadd.f32 %v929_v51, %v926_v25  ;;  %v565_v27 = vadd.f32 %v560_v24, %v2010_v54 }
 0x1bc   : > { %v769_v58 = vadd.f32 %v764_v47, %v755_v42  ;;  %v566_v28 = vadd.f32 %v562_v46, %v2021_v23  ;;  %v960_v41 = vadd.f32 %v958_v35, %v955_v55  ;;  %v989_v42 = vadd.f32 %v987_v53, %v984_v32 }
 0x1bd   : > { %v814_v7 = vmul.f32 %v812_v16, %v469_v60  ;;  %v843_v57 = vmul.f32 %v841_v19, %v469_v60  ;;  %v872_v10 = vmul.f32 %v870_v20, %v469_v60  ;;  %v901_v11 = vmul.f32 %v899_v21, %v469_v60 }
 0x1be   : > { %v2099_v62 = vadd.f32 %v775_v12, %v769_v58  ;;  %v930_v44 = vmul.f32 %v928_v4, %v469_v60  ;;  %v959_v12 = vmul.f32 %v957_v31, %v469_v60  ;;  %v988_v43 = vmul.f32 %v986_v36, %v469_v60 }
 0x1bf   : > { %v766_v1 = vpop.permute.xlu1 %765  ;;  %v574_v3 = vpop.permute.xlu0 %573  ;;  %v1017_v16 = vmul.f32 %v1015_v22, %v469_v60  ;;  %v1018_v21 = vadd.f32 %v1016_v63, %v1013_v37  ;;  %v816_v24 = vadd.f32 %v814_v7, %v810_v15  ;;  %v845_v31 = vadd.f32 %v843_v57, %v839_v14 }
 0x1c0   : > { %v770_v54 = vadd.f32 %v766_v1, %v756_v59  ;;  %v579_v4 = vadd.f32 %v574_v3, %v565_v27  ;;  %v874_v36 = vadd.f32 %v872_v10, %v868_v17  ;;  %v903_v22 = vadd.f32 %v901_v11, %v897_v50 }
 0x1c1   : > { %v932_v30 = vadd.f32 %v930_v44, %v926_v25  ;;  %v961_v26 = vadd.f32 %v959_v12, %v955_v55  ;;  %v990_v14 = vadd.f32 %v988_v43, %v984_v32  ;;  %v1019_v17 = vadd.f32 %v1017_v16, %v1013_v37 }
 0x1c2   : > { %v581_v46 = vmax.f32 %v579_v4, 0.0  ;;  %v2140_v15 = vadd.f32 %v2069_v0, %v770_v54  ;;  %v882_v27 = vstv %s2117_s0  ;;  %v1027_v4 = vstv %s2157_s30 }
 0x1c3   : > { %v576_v19 = vpop.permute.xlu1 %575  ;;  %v673_v20 = vpop.permute.xlu0 %672 }
 0x1c4   : > { %v580_v23 = vadd.f32 %v576_v19, %v566_v28  ;;  %v678_v47 = vadd.f32 %v673_v20, %v2043_v2  ;;  %v819_v13 = vmul.f32 %v818_v5, %v581_v46  ;;  %v848_v51 = vmul.f32 %v847_v38, %v581_v46 }
 0x1c5   : > { %v877_v56 = vmul.f32 %v876_v48, %v581_v46  ;;  %v906_v0 = vmul.f32 %v905_v34, %v581_v46  ;;  %v935_v32 = vmul.f32 %v934_v49, %v581_v46  ;;  %v964_v37 = vmul.f32 %v963_v45, %v581_v46 }
 0x1c6   : > { %v582_v50 = vmax.f32 %v580_v23, 0.0  ;;  %v993_v2 = vmul.f32 %v992_v9, %v581_v46  ;;  %v1022_v58 = vmul.f32 %v1021_v33, %v581_v46  ;;  %v821_v59 = vadd.f32 %v819_v13, %v815_v29 }
 0x1c7   : > { %v675_v25 = vpop.permute.xlu1 %674  ;;  %v687_v55 = vpop.permute.xlu0 %686  ;;  %v850_v60 = vadd.f32 %v848_v51, %v844_v6  ;;  %v879_v35 = vadd.f32 %v877_v56, %v873_v40  ;;  %v908_v53 = vadd.f32 %v906_v0, %v902_v39  ;;  %v937_v63 = vadd.f32 %v935_v32, %v931_v52 }
 0x1c8   : > { %v966_v1 = vadd.f32 %v964_v37, %v960_v41  ;;  %v995_v3 = vadd.f32 %v993_v2, %v989_v42  ;;  %v1024_v7 = vadd.f32 %v1022_v58, %v1018_v21  ;;  %v820_v11 = vmul.f32 %v818_v5, %v582_v50 }
 0x1c9   : > { %v849_v29 = vmul.f32 %v847_v38, %v582_v50  ;;  %v878_v6 = vmul.f32 %v876_v48, %v582_v50  ;;  %v907_v40 = vmul.f32 %v905_v34, %v582_v50  ;;  %v936_v39 = vmul.f32 %v934_v49, %v582_v50 }
 0x1ca   : > { %v965_v52 = vmul.f32 %v963_v45, %v582_v50  ;;  %v994_v44 = vmul.f32 %v992_v9, %v582_v50  ;;  %v1023_v12 = vmul.f32 %v1021_v33, %v582_v50  ;;  %v2191_v5 = vadd.f32 %v820_v11, %v816_v24 }
 0x1cb   : > { %v689_v57 = vpop.permute.xlu1 %688  ;;  %v786_v10 = vpop.permute.xlu0 %785  ;;  %v2193_v38 = vadd.f32 %v849_v29, %v845_v31  ;;  %v2195_v48 = vadd.f32 %v878_v6, %v874_v36  ;;  %v2197_v34 = vadd.f32 %v907_v40, %v903_v22  ;;  %v2201_v49 = vadd.f32 %v936_v39, %v932_v30 }
 0x1cc   : > { %v2203_v45 = vadd.f32 %v965_v52, %v961_v26  ;;  %v2205_v9 = vadd.f32 %v994_v44, %v990_v14  ;;  %v2207_v33 = vadd.f32 %v1023_v12, %v1019_v17  ;;  %v911_v28 = vstv %s2121_s2 }
 0x1cd   : > { %v940_v41 = vstv %s2131_s29  ;;  %v692_v42 = vadd.f32 %v687_v55, %v678_v47  ;;  %v679_v19 = vadd.f32 %v675_v25, %v2056_v8  ;;  %v969_v20 = vstv %s2137_s24 }
 0x1ce   : > { %v998_v21 = vstv %s2147_s23  ;;  %v791_v54 = vadd.f32 %v786_v10, %v2099_v62  ;;  %v830_v24 = vstv %s2167_s1  ;;  %v859_v31 = vstv %s2169_s16 }
 0x1cf   : > { %v788_v43 = vpop.permute.xlu1 %787  ;;  %v800_v16 = vpop.permute.xlu0 %799  ;;  %v694_v23 = vmax.f32 %v692_v42, 0.0  ;;  %v693_v36 = vadd.f32 %v689_v57, %v679_v19  ;;  %v888_v30 = vstv %s2171_s27  ;;  %v917_v57 = vstv %s2189_s28 }
 0x1d0   : > { %v792_v22 = vadd.f32 %v788_v43, %v2140_v15  ;;  %v805_v26 = vadd.f32 %v800_v16, %v791_v54  ;;  %v946_v10 = vstv %s2199_s3  ;;  %v975_v11 = vstv %s2209_s4 }
 0x1d1   : > { %v825_v46 = vmul.f32 %v824_v18, %v694_v23  ;;  %v854_v14 = vmul.f32 %v853_v61, %v694_v23  ;;  %v883_v8 = vmul.f32 %v882_v27, %v694_v23  ;;  %v912_v17 = vmul.f32 %v911_v28, %v694_v23 }
 0x1d2   : > { %v941_v50 = vmul.f32 %v940_v41, %v694_v23  ;;  %v970_v62 = vmul.f32 %v969_v20, %v694_v23  ;;  %v999_v47 = vmul.f32 %v998_v21, %v694_v23  ;;  %v1028_v25 = vmul.f32 %v1027_v4, %v694_v23 }
 0x1d3   : > { %v827_v55 = vadd.f32 %v825_v46, %v821_v59  ;;  %v856_v13 = vadd.f32 %v854_v14, %v850_v60  ;;  %v885_v15 = vadd.f32 %v883_v8, %v879_v35  ;;  %v914_v51 = vadd.f32 %v912_v17, %v908_v53  ;;  %v802_v56 = vpop.permute.xlu1 %801 }
 0x1d4   : > { %v943_v0 = vadd.f32 %v941_v50, %v937_v63  ;;  %v972_v32 = vadd.f32 %v970_v62, %v966_v1  ;;  %v1001_v37 = vadd.f32 %v999_v47, %v995_v3  ;;  %v1030_v2 = vadd.f32 %v1028_v25, %v1024_v7 }
 0x1d5   : > { %v695_v58 = vmax.f32 %v693_v36, 0.0  ;;  %v1004_v29 = vstv %s2214_s19  ;;  %v1033_v6 = vstv %s2220_s20  ;;  %v807_v40 = vmax.f32 %v805_v26, 0.0 }
 0x1d6   : > { %v806_v59 = vadd.f32 %v802_v56, %v792_v22 }
 0x1d7   : > { %v826_v60 = vmul.f32 %v824_v18, %v695_v58  ;;  %v855_v35 = vmul.f32 %v853_v61, %v695_v58  ;;  %v884_v53 = vmul.f32 %v882_v27, %v695_v58  ;;  %v913_v63 = vmul.f32 %v911_v28, %v695_v58 }
 0x1d8   : > { %v942_v1 = vmul.f32 %v940_v41, %v695_v58  ;;  %v971_v3 = vmul.f32 %v969_v20, %v695_v58  ;;  %v1000_v7 = vmul.f32 %v998_v21, %v695_v58  ;;  %v1029_v39 = vmul.f32 %v1027_v4, %v695_v58 }
 0x1d9   : > { %v828_v52 = vadd.f32 %v826_v60, %v2191_v5  ;;  %v857_v44 = vadd.f32 %v855_v35, %v2193_v38  ;;  %v886_v12 = vadd.f32 %v884_v53, %v2195_v48  ;;  %v915_v42 = vadd.f32 %v913_v63, %v2197_v34 }
 0x1da   : > { %v944_v18 = vadd.f32 %v942_v1, %v2201_v49  ;;  %v973_v61 = vadd.f32 %v971_v3, %v2203_v45  ;;  %v1002_v27 = vadd.f32 %v1000_v7, %v2205_v9  ;;  %v1031_v28 = vadd.f32 %v1029_v39, %v2207_v33 }
 0x1db   : > { %v831_v41 = vmul.f32 %v830_v24, %v807_v40  ;;  %v860_v43 = vmul.f32 %v859_v31, %v807_v40  ;;  %v889_v5 = vmul.f32 %v888_v30, %v807_v40  ;;  %v918_v38 = vmul.f32 %v917_v57, %v807_v40 }
 0x1dc   : > { %v947_v16 = vmul.f32 %v946_v10, %v807_v40  ;;  %v976_v48 = vmul.f32 %v975_v11, %v807_v40  ;;  %v1005_v19 = vmul.f32 %v1004_v29, %v807_v40  ;;  %v1034_v34 = vmul.f32 %v1033_v6, %v807_v40 }
 0x1dd   : > { %v833_v20 = vadd.f32 %v831_v41, %v827_v55  ;;  %v862_v21 = vadd.f32 %v860_v43, %v856_v13  ;;  %v891_v49 = vadd.f32 %v889_v5, %v885_v15  ;;  %v920_v45 = vadd.f32 %v918_v38, %v914_v51 }
 0x1de   : > { %v949_v54 = vadd.f32 %v947_v16, %v943_v0  ;;  %v978_v9 = vadd.f32 %v976_v48, %v972_v32  ;;  %v1007_v33 = vadd.f32 %v1005_v19, %v1001_v37  ;;  %v1036_v4 = vadd.f32 %v1034_v34, %v1030_v2 }
 0x1df   : > { %836 = vst.msk [vmem:[%s2255_s25] sm:$0xff] %vm835_vm3, %v833_v20  ;;  %1232 = vst.msk [vmem:[%s2255_s25 + $0x10] sm:$0xff] %vm835_vm3, %v862_v21  ;;  %v808_v23 = vmax.f32 %v806_v59, 0.0 }
 0x1e0   : > { %1239 = vst.msk [vmem:[%s2255_s25 + $0x20] sm:$0xff] %vm835_vm3, %v891_v49  ;;  %1246 = vst.msk [vmem:[%s2255_s25 + $0x30] sm:$0xff] %vm835_vm3, %v920_v45 }
 0x1e1   : > { %1253 = vst.msk [vmem:[%s2255_s25 + $0x40] sm:$0xff] %vm835_vm3, %v949_v54  ;;  %1260 = vst.msk [vmem:[%s2255_s25 + $0x50] sm:$0xff] %vm835_vm3, %v978_v9  ;;  %v832_v36 = vmul.f32 %v830_v24, %v808_v23  ;;  %v861_v22 = vmul.f32 %v859_v31, %v808_v23  ;;  %v890_v26 = vmul.f32 %v888_v30, %v808_v23 }
 0x1e2   : > { %1267 = vst.msk [vmem:[%s2255_s25 + $0x60] sm:$0xff] %vm835_vm3, %v1007_v33  ;;  %1274 = vst.msk [vmem:[%s2255_s25 + $0x70] sm:$0xff] %vm835_vm3, %v1036_v4  ;;  %v919_v46 = vmul.f32 %v917_v57, %v808_v23  ;;  %v948_v14 = vmul.f32 %v946_v10, %v808_v23  ;;  %v977_v8 = vmul.f32 %v975_v11, %v808_v23 }
 0x1e3   : > { %v1006_v17 = vmul.f32 %v1004_v29, %v808_v23  ;;  %v1035_v50 = vmul.f32 %v1033_v6, %v808_v23  ;;  %v834_v62 = vadd.f32 %v832_v36, %v828_v52  ;;  %v863_v47 = vadd.f32 %v861_v22, %v857_v44 }
 0x1e4   : > { %v892_v24 = vadd.f32 %v890_v26, %v886_v12  ;;  %v921_v31 = vadd.f32 %v919_v46, %v915_v42  ;;  %v950_v30 = vadd.f32 %v948_v14, %v944_v18  ;;  %v979_v25 = vadd.f32 %v977_v8, %v973_v61 }
 0x1e5   : > { %v1008_v55 = vadd.f32 %v1006_v17, %v1002_v27  ;;  %v1037_v13 = vadd.f32 %v1035_v50, %v1031_v28  ;;  %837 = vst.msk [vmem:[%s2255_s25 + $0x8] sm:$0xff] %vm835_vm3, %v834_v62  ;;  %1233 = vst.msk [vmem:[%s2255_s25 + $0x18] sm:$0xff] %vm835_vm3, %v863_v47 }
 0x1e6   : > { %1240 = vst.msk [vmem:[%s2255_s25 + $0x28] sm:$0xff] %vm835_vm3, %v892_v24  ;;  %1247 = vst.msk [vmem:[%s2255_s25 + $0x38] sm:$0xff] %vm835_vm3, %v921_v31 }
 0x1e7   : > { %1254 = vst.msk [vmem:[%s2255_s25 + $0x48] sm:$0xff] %vm835_vm3, %v950_v30  ;;  %1261 = vst.msk [vmem:[%s2255_s25 + $0x58] sm:$0xff] %vm835_vm3, %v979_v25 }
 0x1e8   : > { %1268 = vst.msk [vmem:[%s2255_s25 + $0x68] sm:$0xff] %vm835_vm3, %v1008_v55  ;;  %1275 = vst.msk [vmem:[%s2255_s25 + $0x78] sm:$0xff] %vm835_vm3, %v1037_v13 }
 0x1e9   : > { %1479 = shalt.err (!%p1476_p6)
}
 0x1ea   : > { %s1480_s14 = scalar_lea.hbm %s2284_s17, 2048  ;;  %s1484_s29 = scalar_lea.hbm %s2350_s5, 4096 }
 0x1eb   : > { %p1481_p11 = scmp.ne.s32.totalorder %s2284_s17, %s1480_s14  ;;  %p1485_p3 = scmp.lt.s32.totalorder %s2284_s17, %s2350_s5 }
 0x1ec   : > { %p1486_p13 = scmp.lt.s32.totalorder %s1484_s29, %s1480_s14 }
 0x1ed   : > { %p1482_p0 = pnand %p1481_p11, %p2392_p5 }
 0x1ee   : > { %p1487_p1 = por %p1486_p13, %p1485_p3 }
 0x1ef   : > { %p1483_p9 = pneg %p1482_p0 }
 0x1f1   : > { %p1488_p2 = pnand %p1487_p1, %p1483_p9 }
 0x1f3   : > { %1491 = shalt.err (!%p1488_p2)
}
 0x1f4   : > { %s1556_s30 = smov 128   ;;  %s1557_s1 = smov 8  }
 0x1f5   : > { %1301 = dma.vmem_to_hbm [thread:$0]  (%p2392_p5), %s2286_s8, 2048, %s2284_s17, %s1042_s26, %s1556_s30, %s1556_s30, %s1557_s1  }
 0x1f6 PF: > { %s2393_s16 = sld [smem:[#allocation22_spill]]  ;;  %s1070_s28 = sand.u32 1, %s1530_s18  }
 0x1f7   : > { %s2394_s27 = sld [smem:[#allocation21_spill]]  ;;  %s1071_s3 = scalar_lea.sflag [#allocation5], %s1070_s28 }
 0x1fc   : > { %p2395_p4 = scmp.ne.s32.totalorder %s2393_s16, 0 }
 0x1fd   : > { %p2396_p8 = scmp.ge.s32.totalorder %s2394_s27, 2 }
 0x1ff   : > { %p1321_p7 = pnand %p2396_p8, %p2395_p4 }
 0x201   : > { %p1322_p12 = pneg %p1321_p7 }
 0x203   : > { %1525 = dma.done.wait (%p1322_p12), %s1071_s3, 2048  }
 0x204   : > { %1527 = vsyncadd (%p1322_p12), %s1071_s3, 4294965248  ;;  %s2397_s21 = sld [smem:[#allocation23_spill]] }
 0x205   : > { %s2398_s18 = sld [smem:[#allocation19_spill]] }
 0x206   : > { %s2399_s19 = sld [smem:[#allocation20_spill]] }
 0x207   : > { %s2400_s20 = sld [smem:[#allocation24_spill]] }
 0x20a   : > { %p21_p10 = scmp.ge.s32.totalorder %s2397_s21, 4  }
 0x20c   :  { %23 = sbr.rel (!%p21_p10) target bundleno = 14 (0xe), region = 112 }
 0x211   :  { %1076 = vsyncpa [#allocation4], 1 }
 0x212   :  { %1078 = vsyncpa [#allocation4 + $0x1], 1 }
 0x213   :  { %1079 = vsyncpa [#allocation5], 1 }
 0x214   :  { %1081 = vsyncpa [#allocation5 + $0x1], 1 }
 0x215   :  { %1082 = vsyncpa [#allocation6], 1 }
 0x216   :  { %1084 = vsyncpa [#allocation6 + $0x1], 1 }
 0x217   :  { %1085 = vsyncpa [#allocation9], 1 }
 0x218   :  { %1086 = vsyncpa [#allocation12], 1 }

</bundles_post_ra>
